<compile_context>
chip_gen: v5e
topology: v5e:2x2
jax: 0.10.0
libtpu: 0.0.40
codegen_flags: <defaults>
</compile_context>

<pallas_src>
import jax
import jax.numpy as jnp
from jax import lax
from jax.experimental import pallas as pl
from jax.experimental.pallas import tpu as pltpu

_LANE = 128                       # channel padding granularity (lane width)
_VMEM_LIMIT = 32 * 1024 * 1024    # explicit scoped-VMEM budget (all TPU gens)


def _round_up(x, m):
    return (x + m - 1) // m * m


def _m_tiling(m, max_tile=256):
    """Row-tile for the M axis: multiple of 16, <= max_tile. Returns (tm, m_pad)."""
    tm = _round_up(m, 16) if m <= max_tile else max_tile
    return tm, _round_up(m, tm)


def _pad_rows(x, m_pad):
    return x if x.shape[0] == m_pad else jnp.pad(x, ((0, m_pad - x.shape[0]), (0, 0)))


def _cparams(sems):
    return pltpu.CompilerParams(dimension_semantics=sems,
                                vmem_limit_bytes=_VMEM_LIMIT)


# ----------------------------------------------------------------------------
# 1) Tiled matmul (transposed-conv contraction): bf16 x bf16 -> f32
# ----------------------------------------------------------------------------
def _matmul_kernel(x_ref, w_ref, o_ref, acc_ref):
    @pl.when(pl.program_id(2) == 0)
    def _():
        acc_ref[...] = jnp.zeros_like(acc_ref)

    acc_ref[...] += jnp.dot(x_ref[...], w_ref[...],
                            preferred_element_type=jnp.float32)

    @pl.when(pl.program_id(2) == pl.num_programs(2) - 1)
    def _():
        o_ref[...] = acc_ref[...].astype(o_ref.dtype)


def pallas_matmul(x, w):
    """(M, K) @ (K, N) -> (M, N) f32.  K and N are multiples of 128."""
    m, k = x.shape
    _, n = w.shape
    tm, m_pad = _m_tiling(m, max_tile=256)
    x = _pad_rows(x, m_pad)
    tn = 256 if n % 256 == 0 else (128 if n % 128 == 0 else n)
    tk = k if k <= 512 else (512 if k % 512 == 0 else 128)
    out = pl.pallas_call(
        _matmul_kernel,
        grid=(m_pad // tm, n // tn, k // tk),
        in_specs=[pl.BlockSpec((tm, tk), lambda i, j, kk: (i, kk)),
                  pl.BlockSpec((tk, tn), lambda i, j, kk: (kk, j))],
        out_specs=pl.BlockSpec((tm, tn), lambda i, j, kk: (i, j)),
        out_shape=jax.ShapeDtypeStruct((m_pad, n), jnp.float32),
        scratch_shapes=[pltpu.VMEM((tm, tn), jnp.float32)],
        compiler_params=_cparams(("parallel", "parallel", "arbitrary")),
    )(x, w)
    return out[:m] if m_pad != m else out


# ----------------------------------------------------------------------------
# 2) BatchNorm pass 1: per-channel sum / sum-of-squares over M (tiled, resident acc)
# ----------------------------------------------------------------------------
def _bn_stats_kernel(x_ref, sum_ref, sq_ref):
    @pl.when(pl.program_id(0) == 0)
    def _():
        sum_ref[...] = jnp.zeros_like(sum_ref)
        sq_ref[...] = jnp.zeros_like(sq_ref)

    x = x_ref[...]
    sum_ref[...] += jnp.sum(x, axis=0, keepdims=True)
    sq_ref[...] += jnp.sum(x * x, axis=0, keepdims=True)


def pallas_bn_stats(x2d):
    m, c = x2d.shape
    tm, m_pad = _m_tiling(m)
    x2d = _pad_rows(x2d, m_pad)   # padded zero rows add 0 to both sums
    return pl.pallas_call(
        _bn_stats_kernel,
        grid=(m_pad // tm,),
        in_specs=[pl.BlockSpec((tm, c), lambda i: (i, 0))],
        out_specs=(pl.BlockSpec((1, c), lambda i: (0, 0)),
                   pl.BlockSpec((1, c), lambda i: (0, 0))),
        out_shape=(jax.ShapeDtypeStruct((1, c), jnp.float32),
                   jax.ShapeDtypeStruct((1, c), jnp.float32)),
        compiler_params=_cparams(("arbitrary",)),
    )(x2d)


# ----------------------------------------------------------------------------
# 3) BatchNorm pass 2: folded scale/shift + ReLU, bf16 output (tiled over M)
# ----------------------------------------------------------------------------
def _scale_shift_relu_kernel(x_ref, a_ref, b_ref, o_ref):
    y = x_ref[...] * a_ref[...] + b_ref[...]
    o_ref[...] = jnp.maximum(y, 0.0).astype(o_ref.dtype)


def pallas_scale_shift_relu(x2d, scale, shift, out_dtype=jnp.bfloat16):
    m, c = x2d.shape
    tm, m_pad = _m_tiling(m)
    x2d = _pad_rows(x2d, m_pad)
    out = pl.pallas_call(
        _scale_shift_relu_kernel,
        grid=(m_pad // tm,),
        in_specs=[pl.BlockSpec((tm, c), lambda i: (i, 0)),
                  pl.BlockSpec((1, c), lambda i: (0, 0)),
                  pl.BlockSpec((1, c), lambda i: (0, 0))],
        out_specs=pl.BlockSpec((tm, c), lambda i: (i, 0)),
        out_shape=jax.ShapeDtypeStruct((m_pad, c), out_dtype),
        compiler_params=_cparams(("parallel",)),
    )(x2d, scale, shift)
    return out[:m] if m_pad != m else out


# ----------------------------------------------------------------------------
# 4) Last layer: bias + tanh (tiled over M), f32 output
# ----------------------------------------------------------------------------
def _bias_tanh_kernel(x_ref, b_ref, o_ref):
    o_ref[...] = jnp.tanh(x_ref[...] + b_ref[...]).astype(o_ref.dtype)


def pallas_bias_tanh(x2d, bias):
    m, c = x2d.shape
    tm, m_pad = _m_tiling(m)
    x2d = _pad_rows(x2d, m_pad)
    out = pl.pallas_call(
        _bias_tanh_kernel,
        grid=(m_pad // tm,),
        in_specs=[pl.BlockSpec((tm, c), lambda i: (i, 0)),
                  pl.BlockSpec((1, c), lambda i: (0, 0))],
        out_specs=pl.BlockSpec((tm, c), lambda i: (i, 0)),
        out_shape=jax.ShapeDtypeStruct((m_pad, c), jnp.float32),
        compiler_params=_cparams(("parallel",)),
    )(x2d, bias)
    return out[:m] if m_pad != m else out


# ----------------------------------------------------------------------------
# 5) Overlap-add ("col2im") for ConvTranspose2d(k=4, s=2, p=1), parity-grouped
# ----------------------------------------------------------------------------
def overlap_add_stride2(y6):
    """y6: (n, h, w, 4, 4, c) tap contributions -> (n, 2h, 2w, c).

    Output row r = 2m + p (after cropping padding=1) receives:
      p=0: taps kh=1 @ i=m   and kh=3 @ i=m-1
      p=1: taps kh=0 @ i=m+1 and kh=2 @ i=m
    (identically along W): 4 shifted adds per parity class + one interleave.
    """
    n, h, w, _, _, c = y6.shape

    def shift_m1(t, axis):                 # t'[i] = t[i-1], zero at i=0
        pad = [(0, 0)] * t.ndim
        pad[axis] = (1, 0)
        return lax.slice_in_dim(jnp.pad(t, pad), 0, t.shape[axis], axis=axis)

    def shift_p1(t, axis):                 # t'[i] = t[i+1], zero at i=last
        pad = [(0, 0)] * t.ndim
        pad[axis] = (0, 1)
        return lax.slice_in_dim(jnp.pad(t, pad), 1, t.shape[axis] + 1, axis=axis)

    ident = lambda t, axis: t
    taps = {0: ((1, ident), (3, shift_m1)), 1: ((0, shift_p1), (2, ident))}

    parity = [[None, None], [None, None]]
    for ph in (0, 1):
        for pw in (0, 1):
            acc = None
            for kh, fh in taps[ph]:
                for kw, fw in taps[pw]:
                    t = fh(fw(y6[:, :, :, kh, kw, :], 2), 1)
                    acc = t if acc is None else acc + t
            parity[ph][pw] = acc
    rows = [jnp.stack([parity[ph][0], parity[ph][1]], axis=3) for ph in (0, 1)]
    out = jnp.stack(rows, axis=2)          # (n, h, 2, w, 2, c)
    return out.reshape(n, 2 * h, 2 * w, c)


# ----------------------------------------------------------------------------
# Generator parameters + forward (mirrors the PyTorch module)
# ----------------------------------------------------------------------------
def init_generator_params(key, latent_size, generator_filters, num_layers):
    params = []
    for layer in range(num_layers):
        if layer == 0:
            cin, cout = latent_size, generator_filters * 2 ** (num_layers - 2)
            first, last = True, False
        elif layer == num_layers - 1:
            cin, cout = generator_filters, 3
            first, last = False, True
        else:
            cin = generator_filters * 2 ** (num_layers - 1 - layer)
            cout = generator_filters * 2 ** (num_layers - 2 - layer)
            first, last = False, False
        key, kw_, kb_ = jax.random.split(key, 3)
        bound = 1.0 / float(cin * 16) ** 0.5
        w = jax.random.uniform(kw_, (cin, cout, 4, 4), jnp.float32, -bound, bound)
        b = jax.random.uniform(kb_, (cout,), jnp.float32, -bound, bound)
        cin_p, cout_p = _round_up(cin, _LANE), _round_up(cout, _LANE)
        # Pre-flattened, channel-padded, bf16 weight: (Cin_p, kH*kW*Cout_p)
        w_pad = jnp.zeros((cin_p, 4, 4, cout_p), jnp.float32)
        w_pad = w_pad.at[:cin, :, :, :cout].set(jnp.transpose(w, (0, 2, 3, 1)))
        p = {
            "w": w_pad.reshape(cin_p, 16 * cout_p).astype(jnp.bfloat16),
            "b": jnp.zeros((cout_p,), jnp.float32).at[:cout].set(b),
            "cout": cout,
            "first": first,
            "last": last,
        }
        if not last:  # BatchNorm2d defaults: weight=1, bias=0
            p["gamma"] = jnp.zeros((cout_p,), jnp.float32).at[:cout].set(1.0)
            p["beta"] = jnp.zeros((cout_p,), jnp.float32)
        params.append(p)
    return params


def generator_forward(params, latent_nchw):
    n = latent_nchw.shape[0]
    x = None
    for p in params:
        cout_p = p["w"].shape[1] // 16
        if p["first"]:
            cin_p = p["w"].shape[0]
            xin = latent_nchw.reshape(n, -1)
            if xin.shape[1] < cin_p:
                xin = jnp.pad(xin, ((0, 0), (0, cin_p - xin.shape[1])))
            y = pallas_matmul(xin.astype(jnp.bfloat16), p["w"])   # (n, 16*Cout_p)
            x = y.reshape(n, 4, 4, cout_p)                        # s=1, p=0 on 1x1
        else:
            nb, h, w_, cin_p = x.shape
            y = pallas_matmul(x.reshape(nb * h * w_, cin_p), p["w"])
            x = overlap_add_stride2(y.reshape(nb, h, w_, 4, 4, cout_p))

        nb, h, w_, cp = x.shape
        m = nb * h * w_
        x2d = x.reshape(m, cp)
        if p["last"]:
            out2d = pallas_bias_tanh(x2d, p["b"].reshape(1, cp))
            x = out2d.reshape(nb, h, w_, cp)[..., :p["cout"]]
        else:
            # Conv bias cancels exactly under batch-stat BatchNorm -> not applied.
            ssum, ssq = pallas_bn_stats(x2d)
            mean = ssum / m
            var = jnp.maximum(ssq / m - mean * mean, 0.0)
            scale = p["gamma"].reshape(1, cp) * lax.rsqrt(var + 1e-5)
            shift = p["beta"].reshape(1, cp) - mean * scale
            x2d = pallas_scale_shift_relu(x2d, scale, shift)      # bf16 for next matmul
            x = x2d.reshape(nb, h, w_, cp)
    return jnp.transpose(x, (0, 3, 1, 2)).astype(jnp.float32)     # NCHW like PyTorch


# ----------------------------------------------------------------------------
if __name__ == "__main__":
    latent_size, generator_filters, num_layers = 8, 4, 3
    batch = 2

    key = jax.random.PRNGKey(0)
    k_params, k_x = jax.random.split(key)
    params = init_generator_params(k_params, latent_size, generator_filters, num_layers)
    latent = jax.random.normal(k_x, (batch, latent_size, 1, 1), jnp.float32)

    fwd = jax.jit(lambda z: generator_forward(params, z))
    out = jax.block_until_ready(fwd(latent))

    side = 4 * 2 ** (num_layers - 1)
    assert out.shape == (batch, 3, side, side), out.shape
    assert bool(jnp.all(jnp.isfinite(out)))
    assert bool(jnp.all(jnp.abs(out) <= 1.0 + 1e-6))  # tanh output range
    print("KERNEL_OK")
</pallas_src>

<mosaic_0001>
module attributes {stable_mosaic.version = 11 : i64} {
  func.func @_matmul_kernel(%arg0: i32, %arg1: i32, %arg2: i32, %arg3: memref<16x128xbf16, #tpu.memory_space<vmem>>, %arg4: memref<128x256xbf16, #tpu.memory_space<vmem>>, %arg5: memref<16x256xf32, #tpu.memory_space<vmem>>, %arg6: memref<16x256xf32, #tpu.memory_space<vmem>>) attributes {dimension_semantics = [#tpu.dimension_semantics<parallel>, #tpu.dimension_semantics<parallel>, #tpu.dimension_semantics<arbitrary>], iteration_bounds = array<i64: 1, 8, 1>, scalar_prefetch = 0 : i64, scratch_operands = 1 : i64, tpu.core_type = #tpu.core_type<tc>, window_params = [{transform_indices = @transform_0, window_bounds = array<i64: 16, 128>}, {transform_indices = @transform_1, window_bounds = array<i64: 128, 256>}, {transform_indices = @transform_2, window_bounds = array<i64: 16, 256>}]} {
    %c0_i32 = arith.constant 0 : i32
    %0 = arith.cmpi eq, %arg2, %c0_i32 : i32
    %1 = arith.extui %0 : i1 to i32
    %c0_i32_0 = arith.constant 0 : i32
    %2 = arith.cmpi ne, %1, %c0_i32_0 : i32
    scf.if %2 {
      %cst_10 = arith.constant 0.000000e+00 : f32
      %12 = vector.broadcast %cst_10 : f32 to vector<16x256xf32>
      %c0_11 = arith.constant 0 : index
      %c0_12 = arith.constant 0 : index
      %13 = vector.load %arg6[%c0_11, %c0_12] : memref<16x256xf32, #tpu.memory_space<vmem>>, vector<16x256xf32>
      tpu.vector_store %arg6[%c0_11, %c0_12], %12 {strides = array<i32>} : memref<16x256xf32, #tpu.memory_space<vmem>>, vector<16x256xf32>,
    } else {
    }
    %c0 = arith.constant 0 : index
    %c0_1 = arith.constant 0 : index
    %3 = vector.load %arg6[%c0, %c0_1] : memref<16x256xf32, #tpu.memory_space<vmem>>, vector<16x256xf32>
    %c0_2 = arith.constant 0 : index
    %c0_3 = arith.constant 0 : index
    %4 = vector.load %arg3[%c0_2, %c0_3] : memref<16x128xbf16, #tpu.memory_space<vmem>>, vector<16x128xbf16>
    %c0_4 = arith.constant 0 : index
    %c0_5 = arith.constant 0 : index
    %5 = vector.load %arg4[%c0_4, %c0_5] : memref<128x256xbf16, #tpu.memory_space<vmem>>, vector<128x256xbf16>
    %cst = arith.constant dense<0.000000e+00> : vector<16x256xf32>
    %6 = tpu.matmul %4, %5, %cst {dimension_numbers = #tpu.dot_dimension_numbers<[1], [0], [0], [1], [0, 0, 1, 1], [], []>} : vector<16x128xbf16>, vector<128x256xbf16>, vector<16x256xf32> -> vector<16x256xf32>
    %7 = arith.addf %3, %6 : vector<16x256xf32>
    %c0_6 = arith.constant 0 : index
    %c0_7 = arith.constant 0 : index
    %8 = vector.load %arg6[%c0_6, %c0_7] : memref<16x256xf32, #tpu.memory_space<vmem>>, vector<16x256xf32>
    tpu.vector_store %arg6[%c0_6, %c0_7], %7 {strides = array<i32>} : memref<16x256xf32, #tpu.memory_space<vmem>>, vector<16x256xf32>,
    %c0_i32_8 = arith.constant 0 : i32
    %9 = arith.cmpi eq, %arg2, %c0_i32_8 : i32
    %10 = arith.extui %9 : i1 to i32
    %c0_i32_9 = arith.constant 0 : i32
    %11 = arith.cmpi ne, %10, %c0_i32_9 : i32
    scf.if %11 {
      %c0_10 = arith.constant 0 : index
      %c0_11 = arith.constant 0 : index
      %12 = vector.load %arg6[%c0_10, %c0_11] : memref<16x256xf32, #tpu.memory_space<vmem>>, vector<16x256xf32>
      %c0_12 = arith.constant 0 : index
      %c0_13 = arith.constant 0 : index
      %13 = vector.load %arg5[%c0_12, %c0_13] : memref<16x256xf32, #tpu.memory_space<vmem>>, vector<16x256xf32>
      tpu.vector_store %arg5[%c0_12, %c0_13], %12 {strides = array<i32>} : memref<16x256xf32, #tpu.memory_space<vmem>>, vector<16x256xf32>,
    } else {
    }
    return
  }
  func.func @transform_0(%arg0: i32, %arg1: i32, %arg2: i32) -> (i32, i32) {
    %c0_i32 = arith.constant 0 : i32
    return %arg0, %arg2 : i32, i32
  }
  func.func @transform_1(%arg0: i32, %arg1: i32, %arg2: i32) -> (i32, i32) {
    %c0_i32 = arith.constant 0 : i32
    return %arg2, %arg1 : i32, i32
  }
  func.func @transform_2(%arg0: i32, %arg1: i32, %arg2: i32) -> (i32, i32) {
    %c0_i32 = arith.constant 0 : i32
    return %arg0, %arg1 : i32, i32
  }
}

module attributes {stable_mosaic.version = 11 : i64} {
  func.func @_bn_stats_kernel(%arg0: i32, %arg1: memref<32x128xf32, #tpu.memory_space<vmem>>, %arg2: memref<1x128xf32, #tpu.memory_space<vmem>>, %arg3: memref<1x128xf32, #tpu.memory_space<vmem>>) attributes {dimension_semantics = [#tpu.dimension_semantics<arbitrary>], iteration_bounds = array<i64: 1>, scalar_prefetch = 0 : i64, scratch_operands = 0 : i64, tpu.core_type = #tpu.core_type<tc>, window_params = [{transform_indices = @transform_0, window_bounds = array<i64: 32, 128>}, {pipeline_mode = #tpu.pipeline_mode<synchronous>, transform_indices = @transform_1, window_bounds = array<i64: 1, 128>}, {pipeline_mode = #tpu.pipeline_mode<synchronous>, transform_indices = @transform_2, window_bounds = array<i64: 1, 128>}]} {
    %c0_i32 = arith.constant 0 : i32
    %0 = arith.cmpi eq, %arg0, %c0_i32 : i32
    %1 = arith.extui %0 : i1 to i32
    %c0_i32_0 = arith.constant 0 : i32
    %2 = arith.cmpi ne, %1, %c0_i32_0 : i32
    scf.if %2 {
      %cst_11 = arith.constant 0.000000e+00 : f32
      %15 = vector.broadcast %cst_11 : f32 to vector<1x128xf32>
      %c0_12 = arith.constant 0 : index
      %c0_13 = arith.constant 0 : index
      %16 = vector.load %arg2[%c0_12, %c0_13] : memref<1x128xf32, #tpu.memory_space<vmem>>, vector<1x128xf32>
      tpu.vector_store %arg2[%c0_12, %c0_13], %15 {strides = array<i32>} : memref<1x128xf32, #tpu.memory_space<vmem>>, vector<1x128xf32>,
      %cst_14 = arith.constant 0.000000e+00 : f32
      %17 = vector.broadcast %cst_14 : f32 to vector<1x128xf32>
      %c0_15 = arith.constant 0 : index
      %c0_16 = arith.constant 0 : index
      %18 = vector.load %arg3[%c0_15, %c0_16] : memref<1x128xf32, #tpu.memory_space<vmem>>, vector<1x128xf32>
      tpu.vector_store %arg3[%c0_15, %c0_16], %17 {strides = array<i32>} : memref<1x128xf32, #tpu.memory_space<vmem>>, vector<1x128xf32>,
    } else {
    }
    %c0 = arith.constant 0 : index
    %c0_1 = arith.constant 0 : index
    %3 = vector.load %arg1[%c0, %c0_1] : memref<32x128xf32, #tpu.memory_space<vmem>>, vector<32x128xf32>
    %c0_2 = arith.constant 0 : index
    %c0_3 = arith.constant 0 : index
    %4 = vector.load %arg2[%c0_2, %c0_3] : memref<1x128xf32, #tpu.memory_space<vmem>>, vector<1x128xf32>
    %cst = arith.constant dense<0.000000e+00> : vector<128xf32>
    %5 = vector.multi_reduction <add>, %3, %cst [0] : vector<32x128xf32> to vector<128xf32>
    %6 = vector.shape_cast %5 : vector<128xf32> to vector<1x128xf32>
    %7 = arith.addf %4, %6 : vector<1x128xf32>
    %c0_4 = arith.constant 0 : index
    %c0_5 = arith.constant 0 : index
    %8 = vector.load %arg2[%c0_4, %c0_5] : memref<1x128xf32, #tpu.memory_space<vmem>>, vector<1x128xf32>
    tpu.vector_store %arg2[%c0_4, %c0_5], %7 {strides = array<i32>} : memref<1x128xf32, #tpu.memory_space<vmem>>, vector<1x128xf32>,
    %c0_6 = arith.constant 0 : index
    %c0_7 = arith.constant 0 : index
    %9 = vector.load %arg3[%c0_6, %c0_7] : memref<1x128xf32, #tpu.memory_space<vmem>>, vector<1x128xf32>
    %10 = arith.mulf %3, %3 : vector<32x128xf32>
    %cst_8 = arith.constant dense<0.000000e+00> : vector<128xf32>
    %11 = vector.multi_reduction <add>, %10, %cst_8 [0] : vector<32x128xf32> to vector<128xf32>
    %12 = vector.shape_cast %11 : vector<128xf32> to vector<1x128xf32>
    %13 = arith.addf %9, %12 : vector<1x128xf32>
    %c0_9 = arith.constant 0 : index
    %c0_10 = arith.constant 0 : index
    %14 = vector.load %arg3[%c0_9, %c0_10] : memref<1x128xf32, #tpu.memory_space<vmem>>, vector<1x128xf32>
    tpu.vector_store %arg3[%c0_9, %c0_10], %13 {strides = array<i32>} : memref<1x128xf32, #tpu.memory_space<vmem>>, vector<1x128xf32>,
    return
  }
  func.func @transform_0(%arg0: i32) -> (i32, i32) {
    %c0_i32 = arith.constant 0 : i32
    %c0_i32_0 = arith.constant 0 : i32
    return %arg0, %c0_i32 : i32, i32
  }
  func.func @transform_1(%arg0: i32) -> (i32, i32) {
    %c0_i32 = arith.constant 0 : i32
    %c0_i32_0 = arith.constant 0 : i32
    %c0_i32_1 = arith.constant 0 : i32
    return %c0_i32, %c0_i32_0 : i32, i32
  }
  func.func @transform_2(%arg0: i32) -> (i32, i32) {
    %c0_i32 = arith.constant 0 : i32
    %c0_i32_0 = arith.constant 0 : i32
    %c0_i32_1 = arith.constant 0 : i32
    return %c0_i32, %c0_i32_0 : i32, i32
  }
}

module attributes {stable_mosaic.version = 11 : i64} {
  func.func @_matmul_kernel(%arg0: i32, %arg1: i32, %arg2: i32, %arg3: memref<32x128xbf16, #tpu.memory_space<vmem>>, %arg4: memref<128x256xbf16, #tpu.memory_space<vmem>>, %arg5: memref<32x256xf32, #tpu.memory_space<vmem>>, %arg6: memref<32x256xf32, #tpu.memory_space<vmem>>) attributes {dimension_semantics = [#tpu.dimension_semantics<parallel>, #tpu.dimension_semantics<parallel>, #tpu.dimension_semantics<arbitrary>], iteration_bounds = array<i64: 1, 8, 1>, scalar_prefetch = 0 : i64, scratch_operands = 1 : i64, tpu.core_type = #tpu.core_type<tc>, window_params = [{transform_indices = @transform_0, window_bounds = array<i64: 32, 128>}, {transform_indices = @transform_1, window_bounds = array<i64: 128, 256>}, {transform_indices = @transform_2, window_bounds = array<i64: 32, 256>}]} {
    %c0_i32 = arith.constant 0 : i32
    %0 = arith.cmpi eq, %arg2, %c0_i32 : i32
    %1 = arith.extui %0 : i1 to i32
    %c0_i32_0 = arith.constant 0 : i32
    %2 = arith.cmpi ne, %1, %c0_i32_0 : i32
    scf.if %2 {
      %cst_10 = arith.constant 0.000000e+00 : f32
      %12 = vector.broadcast %cst_10 : f32 to vector<32x256xf32>
      %c0_11 = arith.constant 0 : index
      %c0_12 = arith.constant 0 : index
      %13 = vector.load %arg6[%c0_11, %c0_12] : memref<32x256xf32, #tpu.memory_space<vmem>>, vector<32x256xf32>
      tpu.vector_store %arg6[%c0_11, %c0_12], %12 {strides = array<i32>} : memref<32x256xf32, #tpu.memory_space<vmem>>, vector<32x256xf32>,
    } else {
    }
    %c0 = arith.constant 0 : index
    %c0_1 = arith.constant 0 : index
    %3 = vector.load %arg6[%c0, %c0_1] : memref<32x256xf32, #tpu.memory_space<vmem>>, vector<32x256xf32>
    %c0_2 = arith.constant 0 : index
    %c0_3 = arith.constant 0 : index
    %4 = vector.load %arg3[%c0_2, %c0_3] : memref<32x128xbf16, #tpu.memory_space<vmem>>, vector<32x128xbf16>
    %c0_4 = arith.constant 0 : index
    %c0_5 = arith.constant 0 : index
    %5 = vector.load %arg4[%c0_4, %c0_5] : memref<128x256xbf16, #tpu.memory_space<vmem>>, vector<128x256xbf16>
    %cst = arith.constant dense<0.000000e+00> : vector<32x256xf32>
    %6 = tpu.matmul %4, %5, %cst {dimension_numbers = #tpu.dot_dimension_numbers<[1], [0], [0], [1], [0, 0, 1, 1], [], []>} : vector<32x128xbf16>, vector<128x256xbf16>, vector<32x256xf32> -> vector<32x256xf32>
    %7 = arith.addf %3, %6 : vector<32x256xf32>
    %c0_6 = arith.constant 0 : index
    %c0_7 = arith.constant 0 : index
    %8 = vector.load %arg6[%c0_6, %c0_7] : memref<32x256xf32, #tpu.memory_space<vmem>>, vector<32x256xf32>
    tpu.vector_store %arg6[%c0_6, %c0_7], %7 {strides = array<i32>} : memref<32x256xf32, #tpu.memory_space<vmem>>, vector<32x256xf32>,
    %c0_i32_8 = arith.constant 0 : i32
    %9 = arith.cmpi eq, %arg2, %c0_i32_8 : i32
    %10 = arith.extui %9 : i1 to i32
    %c0_i32_9 = arith.constant 0 : i32
    %11 = arith.cmpi ne, %10, %c0_i32_9 : i32
    scf.if %11 {
      %c0_10 = arith.constant 0 : index
      %c0_11 = arith.constant 0 : index
      %12 = vector.load %arg6[%c0_10, %c0_11] : memref<32x256xf32, #tpu.memory_space<vmem>>, vector<32x256xf32>
      %c0_12 = arith.constant 0 : index
      %c0_13 = arith.constant 0 : index
      %13 = vector.load %arg5[%c0_12, %c0_13] : memref<32x256xf32, #tpu.memory_space<vmem>>, vector<32x256xf32>
      tpu.vector_store %arg5[%c0_12, %c0_13], %12 {strides = array<i32>} : memref<32x256xf32, #tpu.memory_space<vmem>>, vector<32x256xf32>,
    } else {
    }
    return
  }
  func.func @transform_0(%arg0: i32, %arg1: i32, %arg2: i32) -> (i32, i32) {
    %c0_i32 = arith.constant 0 : i32
    return %arg0, %arg2 : i32, i32
  }
  func.func @transform_1(%arg0: i32, %arg1: i32, %arg2: i32) -> (i32, i32) {
    %c0_i32 = arith.constant 0 : i32
    return %arg2, %arg1 : i32, i32
  }
  func.func @transform_2(%arg0: i32, %arg1: i32, %arg2: i32) -> (i32, i32) {
    %c0_i32 = arith.constant 0 : i32
    return %arg0, %arg1 : i32, i32
  }
}

module attributes {stable_mosaic.version = 11 : i64} {
  func.func @_scale_shift_relu_kernel(%arg0: i32, %arg1: memref<32x128xf32, #tpu.memory_space<vmem>>, %arg2: memref<1x128xf32, #tpu.memory_space<vmem>>, %arg3: memref<1x128xf32, #tpu.memory_space<vmem>>, %arg4: memref<32x128xbf16, #tpu.memory_space<vmem>>) attributes {dimension_semantics = [#tpu.dimension_semantics<parallel>], iteration_bounds = array<i64: 1>, scalar_prefetch = 0 : i64, scratch_operands = 0 : i64, tpu.core_type = #tpu.core_type<tc>, window_params = [{transform_indices = @transform_0, window_bounds = array<i64: 32, 128>}, {pipeline_mode = #tpu.pipeline_mode<synchronous>, transform_indices = @transform_1, window_bounds = array<i64: 1, 128>}, {pipeline_mode = #tpu.pipeline_mode<synchronous>, transform_indices = @transform_2, window_bounds = array<i64: 1, 128>}, {transform_indices = @transform_3, window_bounds = array<i64: 32, 128>}]} {
    %c0 = arith.constant 0 : index
    %c0_0 = arith.constant 0 : index
    %0 = vector.load %arg1[%c0, %c0_0] : memref<32x128xf32, #tpu.memory_space<vmem>>, vector<32x128xf32>
    %c0_1 = arith.constant 0 : index
    %c0_2 = arith.constant 0 : index
    %1 = vector.load %arg2[%c0_1, %c0_2] : memref<1x128xf32, #tpu.memory_space<vmem>>, vector<1x128xf32>
    %2 = vector.broadcast %1 : vector<1x128xf32> to vector<32x128xf32>
    %3 = arith.mulf %0, %2 : vector<32x128xf32>
    %c0_3 = arith.constant 0 : index
    %c0_4 = arith.constant 0 : index
    %4 = vector.load %arg3[%c0_3, %c0_4] : memref<1x128xf32, #tpu.memory_space<vmem>>, vector<1x128xf32>
    %5 = vector.broadcast %4 : vector<1x128xf32> to vector<32x128xf32>
    %6 = arith.addf %3, %5 : vector<32x128xf32>
    %cst = arith.constant 0.000000e+00 : f32
    %7 = vector.broadcast %cst : f32 to vector<32x128xf32>
    %8 = arith.maximumf %6, %7 : vector<32x128xf32>
    %9 = arith.truncf %8 : vector<32x128xf32> to vector<32x128xbf16>
    %c0_5 = arith.constant 0 : index
    %c0_6 = arith.constant 0 : index
    %10 = vector.load %arg4[%c0_5, %c0_6] : memref<32x128xbf16, #tpu.memory_space<vmem>>, vector<32x128xbf16>
    tpu.vector_store %arg4[%c0_5, %c0_6], %9 {strides = array<i32>} : memref<32x128xbf16, #tpu.memory_space<vmem>>, vector<32x128xbf16>,
    return
  }
  func.func @transform_0(%arg0: i32) -> (i32, i32) {
    %c0_i32 = arith.constant 0 : i32
    %c0_i32_0 = arith.constant 0 : i32
    return %arg0, %c0_i32 : i32, i32
  }
  func.func @transform_1(%arg0: i32) -> (i32, i32) {
    %c0_i32 = arith.constant 0 : i32
    %c0_i32_0 = arith.constant 0 : i32
    %c0_i32_1 = arith.constant 0 : i32
    return %c0_i32, %c0_i32_0 : i32, i32
  }
  func.func @transform_2(%arg0: i32) -> (i32, i32) {
    %c0_i32 = arith.constant 0 : i32
    %c0_i32_0 = arith.constant 0 : i32
    %c0_i32_1 = arith.constant 0 : i32
    return %c0_i32, %c0_i32_0 : i32, i32
  }
  func.func @transform_3(%arg0: i32) -> (i32, i32) {
    %c0_i32 = arith.constant 0 : i32
    %c0_i32_0 = arith.constant 0 : i32
    return %arg0, %c0_i32 : i32, i32
  }
}

module attributes {stable_mosaic.version = 11 : i64} {
  func.func @_bn_stats_kernel(%arg0: i32, %arg1: memref<128x128xf32, #tpu.memory_space<vmem>>, %arg2: memref<1x128xf32, #tpu.memory_space<vmem>>, %arg3: memref<1x128xf32, #tpu.memory_space<vmem>>) attributes {dimension_semantics = [#tpu.dimension_semantics<arbitrary>], iteration_bounds = array<i64: 1>, scalar_prefetch = 0 : i64, scratch_operands = 0 : i64, tpu.core_type = #tpu.core_type<tc>, window_params = [{transform_indices = @transform_0, window_bounds = array<i64: 128, 128>}, {pipeline_mode = #tpu.pipeline_mode<synchronous>, transform_indices = @transform_1, window_bounds = array<i64: 1, 128>}, {pipeline_mode = #tpu.pipeline_mode<synchronous>, transform_indices = @transform_2, window_bounds = array<i64: 1, 128>}]} {
    %c0_i32 = arith.constant 0 : i32
    %0 = arith.cmpi eq, %arg0, %c0_i32 : i32
    %1 = arith.extui %0 : i1 to i32
    %c0_i32_0 = arith.constant 0 : i32
    %2 = arith.cmpi ne, %1, %c0_i32_0 : i32
    scf.if %2 {
      %cst_11 = arith.constant 0.000000e+00 : f32
      %15 = vector.broadcast %cst_11 : f32 to vector<1x128xf32>
      %c0_12 = arith.constant 0 : index
      %c0_13 = arith.constant 0 : index
      %16 = vector.load %arg2[%c0_12, %c0_13] : memref<1x128xf32, #tpu.memory_space<vmem>>, vector<1x128xf32>
      tpu.vector_store %arg2[%c0_12, %c0_13], %15 {strides = array<i32>} : memref<1x128xf32, #tpu.memory_space<vmem>>, vector<1x128xf32>,
      %cst_14 = arith.constant 0.000000e+00 : f32
      %17 = vector.broadcast %cst_14 : f32 to vector<1x128xf32>
      %c0_15 = arith.constant 0 : index
      %c0_16 = arith.constant 0 : index
      %18 = vector.load %arg3[%c0_15, %c0_16] : memref<1x128xf32, #tpu.memory_space<vmem>>, vector<1x128xf32>
      tpu.vector_store %arg3[%c0_15, %c0_16], %17 {strides = array<i32>} : memref<1x128xf32, #tpu.memory_space<vmem>>, vector<1x128xf32>,
    } else {
    }
    %c0 = arith.constant 0 : index
    %c0_1 = arith.constant 0 : index
    %3 = vector.load %arg1[%c0, %c0_1] : memref<128x128xf32, #tpu.memory_space<vmem>>, vector<128x128xf32>
    %c0_2 = arith.constant 0 : index
    %c0_3 = arith.constant 0 : index
    %4 = vector.load %arg2[%c0_2, %c0_3] : memref<1x128xf32, #tpu.memory_space<vmem>>, vector<1x128xf32>
    %cst = arith.constant dense<0.000000e+00> : vector<128xf32>
    %5 = vector.multi_reduction <add>, %3, %cst [0] : vector<128x128xf32> to vector<128xf32>
    %6 = vector.shape_cast %5 : vector<128xf32> to vector<1x128xf32>
    %7 = arith.addf %4, %6 : vector<1x128xf32>
    %c0_4 = arith.constant 0 : index
    %c0_5 = arith.constant 0 : index
    %8 = vector.load %arg2[%c0_4, %c0_5] : memref<1x128xf32, #tpu.memory_space<vmem>>, vector<1x128xf32>
    tpu.vector_store %arg2[%c0_4, %c0_5], %7 {strides = array<i32>} : memref<1x128xf32, #tpu.memory_space<vmem>>, vector<1x128xf32>,
    %c0_6 = arith.constant 0 : index
    %c0_7 = arith.constant 0 : index
    %9 = vector.load %arg3[%c0_6, %c0_7] : memref<1x128xf32, #tpu.memory_space<vmem>>, vector<1x128xf32>
    %10 = arith.mulf %3, %3 : vector<128x128xf32>
    %cst_8 = arith.constant dense<0.000000e+00> : vector<128xf32>
    %11 = vector.multi_reduction <add>, %10, %cst_8 [0] : vector<128x128xf32> to vector<128xf32>
    %12 = vector.shape_cast %11 : vector<128xf32> to vector<1x128xf32>
    %13 = arith.addf %9, %12 : vector<1x128xf32>
    %c0_9 = arith.constant 0 : index
    %c0_10 = arith.constant 0 : index
    %14 = vector.load %arg3[%c0_9, %c0_10] : memref<1x128xf32, #tpu.memory_space<vmem>>, vector<1x128xf32>
    tpu.vector_store %arg3[%c0_9, %c0_10], %13 {strides = array<i32>} : memref<1x128xf32, #tpu.memory_space<vmem>>, vector<1x128xf32>,
    return
  }
  func.func @transform_0(%arg0: i32) -> (i32, i32) {
    %c0_i32 = arith.constant 0 : i32
    %c0_i32_0 = arith.constant 0 : i32
    return %arg0, %c0_i32 : i32, i32
  }
  func.func @transform_1(%arg0: i32) -> (i32, i32) {
    %c0_i32 = arith.constant 0 : i32
    %c0_i32_0 = arith.constant 0 : i32
    %c0_i32_1 = arith.constant 0 : i32
    return %c0_i32, %c0_i32_0 : i32, i32
  }
  func.func @transform_2(%arg0: i32) -> (i32, i32) {
    %c0_i32 = arith.constant 0 : i32
    %c0_i32_0 = arith.constant 0 : i32
    %c0_i32_1 = arith.constant 0 : i32
    return %c0_i32, %c0_i32_0 : i32, i32
  }
}

module attributes {stable_mosaic.version = 11 : i64} {
  func.func @_scale_shift_relu_kernel(%arg0: i32, %arg1: memref<128x128xf32, #tpu.memory_space<vmem>>, %arg2: memref<1x128xf32, #tpu.memory_space<vmem>>, %arg3: memref<1x128xf32, #tpu.memory_space<vmem>>, %arg4: memref<128x128xbf16, #tpu.memory_space<vmem>>) attributes {dimension_semantics = [#tpu.dimension_semantics<parallel>], iteration_bounds = array<i64: 1>, scalar_prefetch = 0 : i64, scratch_operands = 0 : i64, tpu.core_type = #tpu.core_type<tc>, window_params = [{transform_indices = @transform_0, window_bounds = array<i64: 128, 128>}, {pipeline_mode = #tpu.pipeline_mode<synchronous>, transform_indices = @transform_1, window_bounds = array<i64: 1, 128>}, {pipeline_mode = #tpu.pipeline_mode<synchronous>, transform_indices = @transform_2, window_bounds = array<i64: 1, 128>}, {transform_indices = @transform_3, window_bounds = array<i64: 128, 128>}]} {
    %c0 = arith.constant 0 : index
    %c0_0 = arith.constant 0 : index
    %0 = vector.load %arg1[%c0, %c0_0] : memref<128x128xf32, #tpu.memory_space<vmem>>, vector<128x128xf32>
    %c0_1 = arith.constant 0 : index
    %c0_2 = arith.constant 0 : index
    %1 = vector.load %arg2[%c0_1, %c0_2] : memref<1x128xf32, #tpu.memory_space<vmem>>, vector<1x128xf32>
    %2 = vector.broadcast %1 : vector<1x128xf32> to vector<128x128xf32>
    %3 = arith.mulf %0, %2 : vector<128x128xf32>
    %c0_3 = arith.constant 0 : index
    %c0_4 = arith.constant 0 : index
    %4 = vector.load %arg3[%c0_3, %c0_4] : memref<1x128xf32, #tpu.memory_space<vmem>>, vector<1x128xf32>
    %5 = vector.broadcast %4 : vector<1x128xf32> to vector<128x128xf32>
    %6 = arith.addf %3, %5 : vector<128x128xf32>
    %cst = arith.constant 0.000000e+00 : f32
    %7 = vector.broadcast %cst : f32 to vector<128x128xf32>
    %8 = arith.maximumf %6, %7 : vector<128x128xf32>
    %9 = arith.truncf %8 : vector<128x128xf32> to vector<128x128xbf16>
    %c0_5 = arith.constant 0 : index
    %c0_6 = arith.constant 0 : index
    %10 = vector.load %arg4[%c0_5, %c0_6] : memref<128x128xbf16, #tpu.memory_space<vmem>>, vector<128x128xbf16>
    tpu.vector_store %arg4[%c0_5, %c0_6], %9 {strides = array<i32>} : memref<128x128xbf16, #tpu.memory_space<vmem>>, vector<128x128xbf16>,
    return
  }
  func.func @transform_0(%arg0: i32) -> (i32, i32) {
    %c0_i32 = arith.constant 0 : i32
    %c0_i32_0 = arith.constant 0 : i32
    return %arg0, %c0_i32 : i32, i32
  }
  func.func @transform_1(%arg0: i32) -> (i32, i32) {
    %c0_i32 = arith.constant 0 : i32
    %c0_i32_0 = arith.constant 0 : i32
    %c0_i32_1 = arith.constant 0 : i32
    return %c0_i32, %c0_i32_0 : i32, i32
  }
  func.func @transform_2(%arg0: i32) -> (i32, i32) {
    %c0_i32 = arith.constant 0 : i32
    %c0_i32_0 = arith.constant 0 : i32
    %c0_i32_1 = arith.constant 0 : i32
    return %c0_i32, %c0_i32_0 : i32, i32
  }
  func.func @transform_3(%arg0: i32) -> (i32, i32) {
    %c0_i32 = arith.constant 0 : i32
    %c0_i32_0 = arith.constant 0 : i32
    return %arg0, %c0_i32 : i32, i32
  }
}

module attributes {stable_mosaic.version = 11 : i64} {
  func.func @_matmul_kernel(%arg0: i32, %arg1: i32, %arg2: i32, %arg3: memref<128x128xbf16, #tpu.memory_space<vmem>>, %arg4: memref<128x256xbf16, #tpu.memory_space<vmem>>, %arg5: memref<128x256xf32, #tpu.memory_space<vmem>>, %arg6: memref<128x256xf32, #tpu.memory_space<vmem>>) attributes {dimension_semantics = [#tpu.dimension_semantics<parallel>, #tpu.dimension_semantics<parallel>, #tpu.dimension_semantics<arbitrary>], iteration_bounds = array<i64: 1, 8, 1>, scalar_prefetch = 0 : i64, scratch_operands = 1 : i64, tpu.core_type = #tpu.core_type<tc>, window_params = [{transform_indices = @transform_0, window_bounds = array<i64: 128, 128>}, {transform_indices = @transform_1, window_bounds = array<i64: 128, 256>}, {transform_indices = @transform_2, window_bounds = array<i64: 128, 256>}]} {
    %c0_i32 = arith.constant 0 : i32
    %0 = arith.cmpi eq, %arg2, %c0_i32 : i32
    %1 = arith.extui %0 : i1 to i32
    %c0_i32_0 = arith.constant 0 : i32
    %2 = arith.cmpi ne, %1, %c0_i32_0 : i32
    scf.if %2 {
      %cst_10 = arith.constant 0.000000e+00 : f32
      %12 = vector.broadcast %cst_10 : f32 to vector<128x256xf32>
      %c0_11 = arith.constant 0 : index
      %c0_12 = arith.constant 0 : index
      %13 = vector.load %arg6[%c0_11, %c0_12] : memref<128x256xf32, #tpu.memory_space<vmem>>, vector<128x256xf32>
      tpu.vector_store %arg6[%c0_11, %c0_12], %12 {strides = array<i32>} : memref<128x256xf32, #tpu.memory_space<vmem>>, vector<128x256xf32>,
    } else {
    }
    %c0 = arith.constant 0 : index
    %c0_1 = arith.constant 0 : index
    %3 = vector.load %arg6[%c0, %c0_1] : memref<128x256xf32, #tpu.memory_space<vmem>>, vector<128x256xf32>
    %c0_2 = arith.constant 0 : index
    %c0_3 = arith.constant 0 : index
    %4 = vector.load %arg3[%c0_2, %c0_3] : memref<128x128xbf16, #tpu.memory_space<vmem>>, vector<128x128xbf16>
    %c0_4 = arith.constant 0 : index
    %c0_5 = arith.constant 0 : index
    %5 = vector.load %arg4[%c0_4, %c0_5] : memref<128x256xbf16, #tpu.memory_space<vmem>>, vector<128x256xbf16>
    %cst = arith.constant dense<0.000000e+00> : vector<128x256xf32>
    %6 = tpu.matmul %4, %5, %cst {dimension_numbers = #tpu.dot_dimension_numbers<[1], [0], [0], [1], [0, 0, 1, 1], [], []>} : vector<128x128xbf16>, vector<128x256xbf16>, vector<128x256xf32> -> vector<128x256xf32>
    %7 = arith.addf %3, %6 : vector<128x256xf32>
    %c0_6 = arith.constant 0 : index
    %c0_7 = arith.constant 0 : index
    %8 = vector.load %arg6[%c0_6, %c0_7] : memref<128x256xf32, #tpu.memory_space<vmem>>, vector<128x256xf32>
    tpu.vector_store %arg6[%c0_6, %c0_7], %7 {strides = array<i32>} : memref<128x256xf32, #tpu.memory_space<vmem>>, vector<128x256xf32>,
    %c0_i32_8 = arith.constant 0 : i32
    %9 = arith.cmpi eq, %arg2, %c0_i32_8 : i32
    %10 = arith.extui %9 : i1 to i32
    %c0_i32_9 = arith.constant 0 : i32
    %11 = arith.cmpi ne, %10, %c0_i32_9 : i32
    scf.if %11 {
      %c0_10 = arith.constant 0 : index
      %c0_11 = arith.constant 0 : index
      %12 = vector.load %arg6[%c0_10, %c0_11] : memref<128x256xf32, #tpu.memory_space<vmem>>, vector<128x256xf32>
      %c0_12 = arith.constant 0 : index
      %c0_13 = arith.constant 0 : index
      %13 = vector.load %arg5[%c0_12, %c0_13] : memref<128x256xf32, #tpu.memory_space<vmem>>, vector<128x256xf32>
      tpu.vector_store %arg5[%c0_12, %c0_13], %12 {strides = array<i32>} : memref<128x256xf32, #tpu.memory_space<vmem>>, vector<128x256xf32>,
    } else {
    }
    return
  }
  func.func @transform_0(%arg0: i32, %arg1: i32, %arg2: i32) -> (i32, i32) {
    %c0_i32 = arith.constant 0 : i32
    return %arg0, %arg2 : i32, i32
  }
  func.func @transform_1(%arg0: i32, %arg1: i32, %arg2: i32) -> (i32, i32) {
    %c0_i32 = arith.constant 0 : i32
    return %arg2, %arg1 : i32, i32
  }
  func.func @transform_2(%arg0: i32, %arg1: i32, %arg2: i32) -> (i32, i32) {
    %c0_i32 = arith.constant 0 : i32
    return %arg0, %arg1 : i32, i32
  }
}

module attributes {stable_mosaic.version = 11 : i64} {
  func.func @_bias_tanh_kernel(%arg0: i32, %arg1: memref<256x128xf32, #tpu.memory_space<vmem>>, %arg2: memref<1x128xf32, #tpu.memory_space<vmem>>, %arg3: memref<256x128xf32, #tpu.memory_space<vmem>>) attributes {dimension_semantics = [#tpu.dimension_semantics<parallel>], iteration_bounds = array<i64: 2>, scalar_prefetch = 0 : i64, scratch_operands = 0 : i64, tpu.core_type = #tpu.core_type<tc>, window_params = [{transform_indices = @transform_0, window_bounds = array<i64: 256, 128>}, {pipeline_mode = #tpu.pipeline_mode<synchronous>, transform_indices = @transform_1, window_bounds = array<i64: 1, 128>}, {transform_indices = @transform_2, window_bounds = array<i64: 256, 128>}]} {
    %c0 = arith.constant 0 : index
    %c0_0 = arith.constant 0 : index
    %0 = vector.load %arg1[%c0, %c0_0] : memref<256x128xf32, #tpu.memory_space<vmem>>, vector<256x128xf32>
    %c0_1 = arith.constant 0 : index
    %c0_2 = arith.constant 0 : index
    %1 = vector.load %arg2[%c0_1, %c0_2] : memref<1x128xf32, #tpu.memory_space<vmem>>, vector<1x128xf32>
    %2 = vector.broadcast %1 : vector<1x128xf32> to vector<256x128xf32>
    %3 = arith.addf %0, %2 : vector<256x128xf32>
    %4 = math.tanh %3 : vector<256x128xf32>
    %c0_3 = arith.constant 0 : index
    %c0_4 = arith.constant 0 : index
    %5 = vector.load %arg3[%c0_3, %c0_4] : memref<256x128xf32, #tpu.memory_space<vmem>>, vector<256x128xf32>
    tpu.vector_store %arg3[%c0_3, %c0_4], %4 {strides = array<i32>} : memref<256x128xf32, #tpu.memory_space<vmem>>, vector<256x128xf32>,
    return
  }
  func.func @transform_0(%arg0: i32) -> (i32, i32) {
    %c0_i32 = arith.constant 0 : i32
    %c0_i32_0 = arith.constant 0 : i32
    return %arg0, %c0_i32 : i32, i32
  }
  func.func @transform_1(%arg0: i32) -> (i32, i32) {
    %c0_i32 = arith.constant 0 : i32
    %c0_i32_0 = arith.constant 0 : i32
    %c0_i32_1 = arith.constant 0 : i32
    return %c0_i32, %c0_i32_0 : i32, i32
  }
  func.func @transform_2(%arg0: i32) -> (i32, i32) {
    %c0_i32 = arith.constant 0 : i32
    %c0_i32_0 = arith.constant 0 : i32
    return %arg0, %c0_i32 : i32, i32
  }
}

</mosaic_0001>

<bundles_post_ra>
// kernel: _lambda_.9
= control target key start
LH: loop header
LB: loop body
LE: loop exit
PB: predicated region body
PF: predicated region fallthrough
CT: control target
= control target key end

     0   :  { %v57_v0 = vmov 0.0   ;;  %s103_s1 = inlined_call_operand.vmem [shape: f32[1,128], index: 1, kind: output, shape index: {0}]   ;;  %s104_s2 = inlined_call_operand.vmem [shape: f32[1,128], index: 2, kind: output, shape index: {1}]   ;;  %s105_s0 = inlined_call_operand.vmem [shape: f32[32,128], index: 0, kind: input, shape index: {}]  }
   0x1   :  { %14 = vst [vmem:[%s103_s1] sm:$0x1] %v57_v0  ;;  %v16_v1 = vld [vmem:[%s105_s0] sm:$0xff]  ;;  %v17_v2 = vld [vmem:[%s105_s0 + $0x8] sm:$0xff]  ;;  %v18_v3 = vld [vmem:[%s105_s0 + $0x10] sm:$0xff] }
   0x2   :  { %15 = vst [vmem:[%s104_s2] sm:$0x1] %v57_v0  ;;  %v19_v4 = vld [vmem:[%s105_s0 + $0x18] sm:$0xff]  ;;  %v21_v5 = vadd.f32 %v17_v2, %v16_v1  ;;  %v33_v6 = vmul.f32 %v16_v1, %v16_v1  ;;  %v34_v7 = vmul.f32 %v17_v2, %v17_v2  ;;  %v35_v8 = vmul.f32 %v18_v3, %v18_v3 }
   0x3   :  { %v36_v10 = vmul.f32 %v19_v4, %v19_v4 }
   0x4   :  { %v22_v9 = vadd.f32 %v21_v5, %v18_v3  ;;  %v37_v11 = vadd.f32 %v34_v7, %v33_v6 }
   0x6   :  { %v23_v12 = vadd.f32 %v22_v9, %v19_v4  ;;  %v38_v13 = vadd.f32 %v37_v11, %v35_v8 }
   0x8   :  { %v24_v14 = vrot.slane %v23_v12, 4  ;;  %v39_v15 = vadd.f32 %v38_v13, %v36_v10  ;;  %v20_v24 = vld [vmem:[%s103_s1] sm:$0x1] }
   0x9   :  { %v32_v27 = vld [vmem:[%s104_s2] sm:$0x1] }
   0xa   :  { %v25_v16 = vadd.f32 %v24_v14, %v23_v12  ;;  %v40_v17 = vrot.slane %v39_v15, 4 }
   0xc   :  { %v26_v18 = vrot.slane %v25_v16, 2  ;;  %v41_v19 = vadd.f32 %v40_v17, %v39_v15 }
   0xe   :  { %v27_v20 = vadd.f32 %v26_v18, %v25_v16  ;;  %v42_v21 = vrot.slane %v41_v19, 2 }
  0x10   :  { %v28_v22 = vrot.slane %v27_v20, 1  ;;  %v43_v23 = vadd.f32 %v42_v21, %v41_v19 }
  0x12   :  { %v29_v25 = vadd.f32 %v28_v22, %v27_v20  ;;  %v44_v26 = vrot.slane %v43_v23, 1 }
  0x14   :  { %v30_v28 = vadd.f32 %v29_v25, %v20_v24  ;;  %v45_v29 = vadd.f32 %v44_v26, %v43_v23 }
  0x16   :  { %31 = vst [vmem:[%s103_s1] sm:$0x1] %v30_v28  ;;  %v46_v30 = vadd.f32 %v45_v29, %v32_v27 }
  0x18   :  { %47 = vst [vmem:[%s104_s2] sm:$0x1] %v46_v30 }

// kernel: _lambda_.8
= control target key start
LH: loop header
LB: loop body
LE: loop exit
PB: predicated region body
PF: predicated region fallthrough
CT: control target
= control target key end

     0   :  { %7 = vsyncpa [#allocation4], 0  ;;  %s915_s0 = inlined_call_operand.vmem [shape: bf16[16,128], index: 0, kind: input, shape index: {}]   ;;  %s916_s1 = inlined_call_operand.hbm [shape: bf16[128,2048], index: 1, kind: input, shape index: {}]   ;;  %s917_s2 = inlined_call_operand.vmem [shape: f32[16,2048], index: 2, kind: output, shape index: {}]  }
   0x1   :  { %9 = vsyncpa [#allocation4 + $0x1], 0  ;;  %s780_s9 = smov 0   ;;  %s782_s10 = smov 0  }
   0x2   :  { %s784_s11 = smov 0   ;;  %s786_s12 = smov 0  }
   0x3   :  { %s788_s13 = smov 0   ;;  %s790_s14 = smov 0  }
   0x4 LB: > { %s519_s15 = sadd.s32 4294967295, %s760_s14   ;;  %s30_s16 = sadd.s32 1, %s756_s13  ;;  %s760_s14 = sphi %s790_s14, %s15_s14   ;;  %s756_s13 = sphi %s788_s13, %s925_s13   ;;  %s752_s12 = sphi %s786_s12, %s924_s12   ;;  %s748_s11 = sphi %s784_s11, %s923_s11   ;;  %s744_s10 = sphi %s782_s10, %s922_s10   ;;  %s740_s9 = sphi %s780_s9, %s921_s9  }
   0x5   : > { %p32_p0 = scmp.ge.s32.totalorder %s30_s16, 8  ;;  %s71_s17 = sadd.s32 1, %s748_s11 }
   0x6   : > { %p78_p1 = scmp.ne.s32.totalorder %s748_s11, %s744_s10  ;;  %p79_p2 = scmp.eq.s32.totalorder %s760_s14, 0 }
   0x7   : > { %s927_s16 = smov (%p32_p0, %s30_s16), 0  ;;  %p84_p4 = scmp.ne.s32.totalorder %s744_s10, %s740_s9 }
   0x8   : > { %p816_p3 = por %p79_p2, %p78_p1  ;;  %s67_s19 = ssub.s32 %s756_s13, %s927_s16 }
   0x9   : > { %p85_p5 = scmp.eq.s32.totalorder %s519_s15, 0  ;;  %p69_p6 = scmp.eq.s32.totalorder %s67_s19, 0 }
   0xa   : > { %p110_p7 = scmp.eq.s32.totalorder %s519_s15, 7  ;;  %p628_p10 = scmp.lt.s32.totalorder %s760_s14, 8 }
   0xb   : > { %p823_p8 = por %p85_p5, %p84_p4  ;;  %s148_s23 = sand.u32 1, %s748_s11  }
   0xc   : > { %s828_s21 = scalar_select %p69_p6, %s748_s11, %s71_s17  }
   0xd   : > { %p830_p9 = por %p110_p7, %p78_p1  ;;  %s603_s24 = sshll.u32 %s756_s13, 3 }
   0xe   : > { %s524_s25 = sshll.u32 %s148_s23, 7  ;;  %s160_s28 = scalar_lea.hbm %s916_s1, %s603_s24 }
   0xf   : > { %s161_s29 = sshll.u32 %s160_s28, 4  ;;  %s152_s30 = scalar_lea.vmem [#allocation3], %s524_s25  ;;  %s162_s29 = int_to_ptr.hbm [resolvable:$true] %s161_s29 }
  0x10   : > { %s163_s3 = sshll.u32 %s152_s30, 4  ;;  %p625_p11 = pnand %p628_p10, %p816_p3  ;;  %s164_s3 = int_to_ptr.vmem [resolvable:$true] %s163_s3 }
  0x11   : > { %p527_p12 = scmp.ge.s32.totalorder %s760_s14, 1  ;;  %s149_s4 = scalar_lea.sflag [#allocation4], %s148_s23 }
  0x12   : > { %s762_s5 = smov 1024   ;;  %s763_s6 = smov 128  }
  0x13   : > { %s764_s7 = smov 8   ;;  %p171_p13 = scmp.lt.s32.totalorder %s760_s14, 9 }
  0x14   : > { %627 = dma.hbm_to_vmem [thread:$0]  (!%p625_p11), %s162_s29, 2048, %s164_s3, %s149_s4, %s762_s5, %s763_s6, %s764_s7  }
  0x15   : > { %p172_p0 = pnand %p527_p12, %p171_p13 }
  0x16   : > { %s845_s8 = sand.u32 (!%p172_p0), 1, %s744_s10  }
  0x17   : > { %175 = sbr.rel (%p172_p0) target bundleno = 207 (0xcf), region = 28  ;;  %s528_s9 = sshll.u32 (!%p172_p0), %s845_s8, 7 }
  0x18   : > { %s178_s15 = scalar_lea.sflag (!%p172_p0), [#allocation4], %s845_s8  ;;  %s849_s17 = scalar_lea.vmem (!%p172_p0), [#allocation3], %s528_s9 }
  0x1c   : > { %735 = dma.done.wait (%p823_p8), %s178_s15, 2048  }
  0x1d   : > { %737 = vsyncadd (%p823_p8), %s178_s15, 4294965248  ;;  %v592_v0 = vld [vmem:[%s849_s17 + $0x70] sm:$0xf]  ;;  %v620_v1 = vld [vmem:[%s849_s17 + $0x74] sm:$0xf0]  ;;  %s529_s20 = sshll.u32 %s845_s8, 5 }
  0x1e   : > { %v619_v2 = vld [vmem:[%s849_s17 + $0x74] sm:$0xf]  ;;  %v593_v3 = vor.u32 %v620_v1, %v592_v0  ;;  %v594_v4 = vld [vmem:[%s849_s17 + $0x78] sm:$0xf0]  ;;  %v584_v5 = vld [vmem:[%s849_s17 + $0x60] sm:$0xf] }
  0x1f   : > { %v618_v6 = vld [vmem:[%s849_s17 + $0x64] sm:$0xf0]  ;;  %v597_v7 = vor.u32 %v619_v2, %v594_v4  ;;  %v617_v8 = vld [vmem:[%s849_s17 + $0x64] sm:$0xf]  ;;  %v586_v9 = vld [vmem:[%s849_s17 + $0x68] sm:$0xf0] }
  0x20   : > { %339 = vmatpush.bf16.msra.mxu0 %v593_v3  ;;  %v585_v10 = vor.u32 %v618_v6, %v584_v5  ;;  %v589_v11 = vor.u32 %v617_v8, %v586_v9  ;;  %v576_v12 = vld [vmem:[%s849_s17 + $0x50] sm:$0xf]  ;;  %v616_v13 = vld [vmem:[%s849_s17 + $0x54] sm:$0xf0]  ;;  %v615_v14 = vld [vmem:[%s849_s17 + $0x54] sm:$0xf] }
  0x21   : > { %353 = vmatpush.bf16.msra.mxu1 %v597_v7  ;;  %v578_v15 = vld [vmem:[%s849_s17 + $0x58] sm:$0xf0]  ;;  %v577_v16 = vor.u32 %v616_v13, %v576_v12  ;;  %v568_v18 = vld [vmem:[%s849_s17 + $0x40] sm:$0xf]  ;;  %v614_v19 = vld [vmem:[%s849_s17 + $0x44] sm:$0xf0] }
  0x22   : > { %v581_v17 = vor.u32 %v615_v14, %v578_v15  ;;  %v613_v20 = vld [vmem:[%s849_s17 + $0x44] sm:$0xf]  ;;  %v570_v21 = vld [vmem:[%s849_s17 + $0x48] sm:$0xf0]  ;;  %v569_v22 = vor.u32 %v614_v19, %v568_v18  ;;  %v560_v24 = vld [vmem:[%s849_s17 + $0x30] sm:$0xf] }
  0x23   : > { %v573_v23 = vor.u32 %v613_v20, %v570_v21  ;;  %v612_v25 = vld [vmem:[%s849_s17 + $0x34] sm:$0xf0]  ;;  %v611_v26 = vld [vmem:[%s849_s17 + $0x34] sm:$0xf]  ;;  %v562_v27 = vld [vmem:[%s849_s17 + $0x38] sm:$0xf0] }
  0x24   : > { %340 = vmatpush.bf16.msra.mxu0 %v585_v10  ;;  %v561_v28 = vor.u32 %v612_v25, %v560_v24  ;;  %v565_v29 = vor.u32 %v611_v26, %v562_v27  ;;  %v552_v30 = vld [vmem:[%s849_s17 + $0x20] sm:$0xf]  ;;  %v610_v31 = vld [vmem:[%s849_s17 + $0x24] sm:$0xf0]  ;;  %v609_v32 = vld [vmem:[%s849_s17 + $0x24] sm:$0xf] }
  0x25   : > { %354 = vmatpush.bf16.msra.mxu1 %v589_v11  ;;  %v554_v33 = vld [vmem:[%s849_s17 + $0x28] sm:$0xf0]  ;;  %v553_v34 = vor.u32 %v610_v31, %v552_v30  ;;  %v544_v36 = vld [vmem:[%s849_s17 + $0x10] sm:$0xf]  ;;  %v608_v37 = vld [vmem:[%s849_s17 + $0x14] sm:$0xf0] }
  0x26   : > { %v557_v35 = vor.u32 %v609_v32, %v554_v33  ;;  %v607_v38 = vld [vmem:[%s849_s17 + $0x14] sm:$0xf]  ;;  %v546_v39 = vld [vmem:[%s849_s17 + $0x18] sm:$0xf0]  ;;  %v545_v40 = vor.u32 %v608_v37, %v544_v36  ;;  %v536_v42 = vld [vmem:[%s849_s17] sm:$0xf] }
  0x27   : > { %v549_v41 = vor.u32 %v607_v38, %v546_v39  ;;  %v606_v43 = vld [vmem:[%s849_s17 + $0x4] sm:$0xf0]  ;;  %v605_v44 = vld [vmem:[%s849_s17 + $0x4] sm:$0xf]  ;;  %v538_v45 = vld [vmem:[%s849_s17 + $0x8] sm:$0xf0] }
  0x28   : > { %341 = vmatpush.bf16.msra.mxu0 %v577_v16  ;;  %v537_v46 = vor.u32 %v606_v43, %v536_v42  ;;  %v541_v47 = vor.u32 %v605_v44, %v538_v45  ;;  %v604_v48 = vld [vmem:[%s915_s0] sm:$0xff]  ;;  %s209_s23 = scalar_lea.vmem [#allocation5], %s529_s20  ;;  %s621_s24 = sshll.u32 (%p830_p9), %s752_s12, 4 }
  0x29   : > { %355 = vmatpush.bf16.msra.mxu1 %v581_v17  ;;  %s398_s27 = scalar_lea.vmem (%p830_p9), %s917_s2, %s621_s24 }
  0x2c   : > { %342 = vmatpush.bf16.msra.mxu0 %v569_v22 }
  0x2d   : > { %356 = vmatpush.bf16.msra.mxu1 %v573_v23 }
  0x30   : > { %343 = vmatpush.bf16.msra.mxu0 %v561_v28 }
  0x31   : > { %357 = vmatpush.bf16.msra.mxu1 %v565_v29 }
  0x34   : > { %344 = vmatpush.bf16.msra.mxu0 %v553_v34 }
  0x35   : > { %358 = vmatpush.bf16.msra.mxu1 %v557_v35 }
  0x38   : > { %345 = vmatpush.bf16.msra.mxu0 %v545_v40 }
  0x39   : > { %359 = vmatpush.bf16.msra.mxu1 %v549_v41 }
  0x3c   : > { %346 = vmatpush.bf16.msra.mxu0 %v537_v46 }
  0x3d   : > { %360 = vmatpush.bf16.msra.mxu1 %v541_v47 }
  0x3f   : > { %347 = vmatmul.bf16.vlgmr.msra.gmra.mxu0 %v604_v48 }
  0x40   : > { %361 = vmatmul.bf16.vlgmr.msra.gmra.mxu1 %v604_v48 }
  0xbc   : > { %v348_v49 = vpop.f32.mrf.mxu0 }
  0xbd   : > { %382 = vst [vmem:[%s209_s23] sm:$0xff] %v348_v49  ;;  %v362_v50 = vpop.f32.mrf.mxu1 }
  0xbe   : > { %383 = vst [vmem:[%s209_s23 + $0x8] sm:$0xff] %v362_v50 }
  0xc2   : > { %392 = sbr.rel (!%p830_p9) target bundleno = 207 (0xcf), region = 44 }
  0xc4   : > { %v350_v51 = vpop.f32.mrf.mxu0  ;;  %v411_v53 = vld [vmem:[%s209_s23] sm:$0xff] (%p830_p9) }
  0xc5   : > { %384 = vst [vmem:[%s209_s23 + $0x10] sm:$0xff] %v350_v51  ;;  %v364_v52 = vpop.f32.mrf.mxu1  ;;  %v413_v54 = vld [vmem:[%s209_s23 + $0x8] sm:$0xff] (%p830_p9) }
  0xc6   : > { %385 = vst [vmem:[%s209_s23 + $0x18] sm:$0xff] %v364_v52 }
  0xc7   : > { %412 = vst [vmem:[%s398_s27] sm:$0xff] %v411_v53 }
  0xc8   : > { %414 = vst [vmem:[%s398_s27 + $0x8] sm:$0xff] %v413_v54 }
  0xcc   : > { %v415_v55 = vld [vmem:[%s209_s23 + $0x10] sm:$0xff] }
  0xcd   : > { %v417_v56 = vld [vmem:[%s209_s23 + $0x18] sm:$0xff]  ;;  %416 = vst [vmem:[%s398_s27 + $0x80] sm:$0xff] %v415_v55 }
  0xce   : > { %418 = vst [vmem:[%s398_s27 + $0x88] sm:$0xff] %v417_v56 }
  0xcf PF: > { %s15_s14 = sadd.s32 1, %s760_s14   ;;  %s921_s9 = smov %s744_s10 }
  0xd0   : > { %p12_p1 = scmp.ge.s32.totalorder %s15_s14, 10   ;;  %s922_s10 = smov %s748_s11 }
  0xd1   : > { %s923_s11 = smov %s828_s21  ;;  %s924_s12 = smov %s756_s13 }
  0xd2   : > { %s925_s13 = smov %s927_s16  ;;  %14 = sbr.rel (!%p12_p1) target bundleno = 4 (0x4), region = 102 }
  0xd7   :  { %434 = vsyncpa [#allocation4], 1 }
  0xd8   :  { %436 = vsyncpa [#allocation4 + $0x1], 1 }

// kernel: _lambda_.11
= control target key start
LH: loop header
LB: loop body
LE: loop exit
PB: predicated region body
PF: predicated region fallthrough
CT: control target
= control target key end

     0   :  { %7 = vsyncpa [#allocation4], 0  ;;  %s1007_s0 = inlined_call_operand.vmem [shape: bf16[32,128], index: 0, kind: input, shape index: {}]   ;;  %s1008_s1 = inlined_call_operand.hbm [shape: bf16[128,2048], index: 1, kind: input, shape index: {}]   ;;  %s1009_s2 = inlined_call_operand.vmem [shape: f32[32,2048], index: 2, kind: output, shape index: {}]  }
   0x1   :  { %9 = vsyncpa [#allocation4 + $0x1], 0  ;;  %s851_s9 = smov 0   ;;  %s853_s10 = smov 0  }
   0x2   :  { %s855_s11 = smov 0   ;;  %s857_s12 = smov 0  }
   0x3   :  { %s859_s13 = smov 0   ;;  %s861_s14 = smov 0  }
   0x4 LB: > { %s569_s15 = sadd.s32 4294967295, %s831_s14   ;;  %s30_s16 = sadd.s32 1, %s827_s13  ;;  %s831_s14 = sphi %s861_s14, %s15_s14   ;;  %s827_s13 = sphi %s859_s13, %s1017_s13   ;;  %s823_s12 = sphi %s857_s12, %s1016_s12   ;;  %s819_s11 = sphi %s855_s11, %s1015_s11   ;;  %s815_s10 = sphi %s853_s10, %s1014_s10   ;;  %s811_s9 = sphi %s851_s9, %s1013_s9  }
   0x5   : > { %p32_p0 = scmp.ge.s32.totalorder %s30_s16, 8  ;;  %s71_s17 = sadd.s32 1, %s819_s11 }
   0x6   : > { %p78_p1 = scmp.ne.s32.totalorder %s819_s11, %s815_s10  ;;  %p79_p2 = scmp.eq.s32.totalorder %s831_s14, 0 }
   0x7   : > { %s1019_s16 = smov (%p32_p0, %s30_s16), 0  ;;  %p84_p4 = scmp.ne.s32.totalorder %s815_s10, %s811_s9 }
   0x8   : > { %p887_p3 = por %p79_p2, %p78_p1  ;;  %s67_s19 = ssub.s32 %s827_s13, %s1019_s16 }
   0x9   : > { %p85_p5 = scmp.eq.s32.totalorder %s569_s15, 0  ;;  %p69_p6 = scmp.eq.s32.totalorder %s67_s19, 0 }
   0xa   : > { %p110_p7 = scmp.eq.s32.totalorder %s569_s15, 7  ;;  %p699_p10 = scmp.lt.s32.totalorder %s831_s14, 8 }
   0xb   : > { %p894_p8 = por %p85_p5, %p84_p4  ;;  %s148_s23 = sand.u32 1, %s819_s11  }
   0xc   : > { %s899_s21 = scalar_select %p69_p6, %s819_s11, %s71_s17  }
   0xd   : > { %p901_p9 = por %p110_p7, %p78_p1  ;;  %s657_s24 = sshll.u32 %s827_s13, 3 }
   0xe   : > { %s574_s25 = sshll.u32 %s148_s23, 7  ;;  %s160_s28 = scalar_lea.hbm %s1008_s1, %s657_s24 }
   0xf   : > { %s161_s29 = sshll.u32 %s160_s28, 4  ;;  %s152_s30 = scalar_lea.vmem [#allocation3], %s574_s25  ;;  %s162_s29 = int_to_ptr.hbm [resolvable:$true] %s161_s29 }
  0x10   : > { %s163_s3 = sshll.u32 %s152_s30, 4  ;;  %p696_p11 = pnand %p699_p10, %p887_p3  ;;  %s164_s3 = int_to_ptr.vmem [resolvable:$true] %s163_s3 }
  0x11   : > { %p577_p12 = scmp.ge.s32.totalorder %s831_s14, 1  ;;  %s149_s4 = scalar_lea.sflag [#allocation4], %s148_s23 }
  0x12   : > { %s833_s5 = smov 1024   ;;  %s834_s6 = smov 128  }
  0x13   : > { %s835_s7 = smov 8   ;;  %p171_p13 = scmp.lt.s32.totalorder %s831_s14, 9 }
  0x14   : > { %698 = dma.hbm_to_vmem [thread:$0]  (!%p696_p11), %s162_s29, 2048, %s164_s3, %s149_s4, %s833_s5, %s834_s6, %s835_s7  }
  0x15   : > { %p172_p0 = pnand %p577_p12, %p171_p13 }
  0x16   : > { %s916_s8 = sand.u32 (!%p172_p0), 1, %s815_s10  }
  0x17   : > { %175 = sbr.rel (%p172_p0) target bundleno = 213 (0xd5), region = 28  ;;  %s578_s9 = sshll.u32 (!%p172_p0), %s916_s8, 7 }
  0x18   : > { %s178_s15 = scalar_lea.sflag (!%p172_p0), [#allocation4], %s916_s8  ;;  %s920_s17 = scalar_lea.vmem (!%p172_p0), [#allocation3], %s578_s9 }
  0x1c   : > { %806 = dma.done.wait (%p894_p8), %s178_s15, 2048  }
  0x1d   : > { %808 = vsyncadd (%p894_p8), %s178_s15, 4294965248  ;;  %v646_v0 = vld [vmem:[%s920_s17 + $0x70] sm:$0xf]  ;;  %v675_v1 = vld [vmem:[%s920_s17 + $0x74] sm:$0xf0]  ;;  %s579_s24 = sshll.u32 %s916_s8, 6 }
  0x1e   : > { %v674_v2 = vld [vmem:[%s920_s17 + $0x74] sm:$0xf]  ;;  %v647_v3 = vor.u32 %v675_v1, %v646_v0  ;;  %v648_v4 = vld [vmem:[%s920_s17 + $0x78] sm:$0xf0]  ;;  %v638_v5 = vld [vmem:[%s920_s17 + $0x60] sm:$0xf] }
  0x1f   : > { %v673_v6 = vld [vmem:[%s920_s17 + $0x64] sm:$0xf0]  ;;  %v651_v7 = vor.u32 %v674_v2, %v648_v4  ;;  %v672_v8 = vld [vmem:[%s920_s17 + $0x64] sm:$0xf]  ;;  %v640_v9 = vld [vmem:[%s920_s17 + $0x68] sm:$0xf0] }
  0x20   : > { %355 = vmatpush.bf16.msra.mxu0 %v647_v3  ;;  %677 = vmatpush.bf16.msra.mxu2 %v647_v3  ;;  %v639_v10 = vor.u32 %v673_v6, %v638_v5  ;;  %v643_v11 = vor.u32 %v672_v8, %v640_v9  ;;  %v630_v12 = vld [vmem:[%s920_s17 + $0x50] sm:$0xf]  ;;  %v671_v13 = vld [vmem:[%s920_s17 + $0x54] sm:$0xf0]  ;;  %v670_v14 = vld [vmem:[%s920_s17 + $0x54] sm:$0xf] }
  0x21   : > { %374 = vmatpush.bf16.msra.mxu1 %v651_v7  ;;  %685 = vmatpush.bf16.msra.mxu3 %v651_v7  ;;  %v632_v15 = vld [vmem:[%s920_s17 + $0x58] sm:$0xf0]  ;;  %v631_v16 = vor.u32 %v671_v13, %v630_v12  ;;  %v622_v18 = vld [vmem:[%s920_s17 + $0x40] sm:$0xf]  ;;  %v669_v19 = vld [vmem:[%s920_s17 + $0x44] sm:$0xf0] }
  0x22   : > { %v635_v17 = vor.u32 %v670_v14, %v632_v15  ;;  %v668_v20 = vld [vmem:[%s920_s17 + $0x44] sm:$0xf]  ;;  %v624_v21 = vld [vmem:[%s920_s17 + $0x48] sm:$0xf0]  ;;  %v623_v22 = vor.u32 %v669_v19, %v622_v18  ;;  %v614_v24 = vld [vmem:[%s920_s17 + $0x30] sm:$0xf] }
  0x23   : > { %v627_v23 = vor.u32 %v668_v20, %v624_v21  ;;  %v667_v25 = vld [vmem:[%s920_s17 + $0x34] sm:$0xf0]  ;;  %v666_v26 = vld [vmem:[%s920_s17 + $0x34] sm:$0xf]  ;;  %v616_v27 = vld [vmem:[%s920_s17 + $0x38] sm:$0xf0] }
  0x24   : > { %356 = vmatpush.bf16.msra.mxu0 %v639_v10  ;;  %678 = vmatpush.bf16.msra.mxu2 %v639_v10  ;;  %v615_v28 = vor.u32 %v667_v25, %v614_v24  ;;  %v619_v29 = vor.u32 %v666_v26, %v616_v27  ;;  %v606_v30 = vld [vmem:[%s920_s17 + $0x20] sm:$0xf]  ;;  %v665_v31 = vld [vmem:[%s920_s17 + $0x24] sm:$0xf0]  ;;  %v664_v32 = vld [vmem:[%s920_s17 + $0x24] sm:$0xf] }
  0x25   : > { %375 = vmatpush.bf16.msra.mxu1 %v643_v11  ;;  %686 = vmatpush.bf16.msra.mxu3 %v643_v11  ;;  %v608_v33 = vld [vmem:[%s920_s17 + $0x28] sm:$0xf0]  ;;  %v607_v34 = vor.u32 %v665_v31, %v606_v30  ;;  %v598_v36 = vld [vmem:[%s920_s17 + $0x10] sm:$0xf]  ;;  %v663_v37 = vld [vmem:[%s920_s17 + $0x14] sm:$0xf0] }
  0x26   : > { %v611_v35 = vor.u32 %v664_v32, %v608_v33  ;;  %v662_v38 = vld [vmem:[%s920_s17 + $0x14] sm:$0xf]  ;;  %v600_v39 = vld [vmem:[%s920_s17 + $0x18] sm:$0xf0]  ;;  %v599_v40 = vor.u32 %v663_v37, %v598_v36  ;;  %v590_v42 = vld [vmem:[%s920_s17] sm:$0xf] }
  0x27   : > { %v603_v41 = vor.u32 %v662_v38, %v600_v39  ;;  %v661_v43 = vld [vmem:[%s920_s17 + $0x4] sm:$0xf0]  ;;  %v660_v44 = vld [vmem:[%s920_s17 + $0x4] sm:$0xf]  ;;  %v592_v45 = vld [vmem:[%s920_s17 + $0x8] sm:$0xf0] }
  0x28   : > { %357 = vmatpush.bf16.msra.mxu0 %v631_v16  ;;  %679 = vmatpush.bf16.msra.mxu2 %v631_v16  ;;  %v591_v46 = vor.u32 %v661_v43, %v590_v42  ;;  %v595_v47 = vor.u32 %v660_v44, %v592_v45  ;;  %v658_v48 = vld [vmem:[%s1007_s0] sm:$0xff]  ;;  %v659_v49 = vld [vmem:[%s1007_s0 + $0x8] sm:$0xff]  ;;  %s965_s25 = scalar_lea.vmem [#allocation5], %s579_s24  ;;  %s676_s26 = sshll.u32 (%p901_p9), %s823_s12, 4 }
  0x29   : > { %376 = vmatpush.bf16.msra.mxu1 %v635_v17  ;;  %687 = vmatpush.bf16.msra.mxu3 %v635_v17  ;;  %s440_s29 = scalar_lea.vmem (%p901_p9), %s1009_s2, %s676_s26 }
  0x2c   : > { %358 = vmatpush.bf16.msra.mxu0 %v623_v22  ;;  %680 = vmatpush.bf16.msra.mxu2 %v623_v22 }
  0x2d   : > { %377 = vmatpush.bf16.msra.mxu1 %v627_v23  ;;  %688 = vmatpush.bf16.msra.mxu3 %v627_v23 }
  0x30   : > { %359 = vmatpush.bf16.msra.mxu0 %v615_v28  ;;  %681 = vmatpush.bf16.msra.mxu2 %v615_v28 }
  0x31   : > { %378 = vmatpush.bf16.msra.mxu1 %v619_v29  ;;  %689 = vmatpush.bf16.msra.mxu3 %v619_v29 }
  0x34   : > { %360 = vmatpush.bf16.msra.mxu0 %v607_v34  ;;  %682 = vmatpush.bf16.msra.mxu2 %v607_v34 }
  0x35   : > { %379 = vmatpush.bf16.msra.mxu1 %v611_v35  ;;  %690 = vmatpush.bf16.msra.mxu3 %v611_v35 }
  0x38   : > { %361 = vmatpush.bf16.msra.mxu0 %v599_v40  ;;  %683 = vmatpush.bf16.msra.mxu2 %v599_v40 }
  0x39   : > { %380 = vmatpush.bf16.msra.mxu1 %v603_v41  ;;  %691 = vmatpush.bf16.msra.mxu3 %v603_v41 }
  0x3c   : > { %362 = vmatpush.bf16.msra.mxu0 %v591_v46  ;;  %684 = vmatpush.bf16.msra.mxu2 %v591_v46 }
  0x3d   : > { %381 = vmatpush.bf16.msra.mxu1 %v595_v47  ;;  %692 = vmatpush.bf16.msra.mxu3 %v595_v47 }
  0x3f   : > { %363 = vmatmul.bf16.vlgmr.msra.gmra.mxu0 %v658_v48  ;;  %368 = vmatmul.bf16.vlgmr.msra.gmra.mxu2 %v659_v49 }
  0x40   : > { %382 = vmatmul.bf16.vlgmr.msra.gmra.mxu1 %v658_v48  ;;  %387 = vmatmul.bf16.vlgmr.msra.gmra.mxu3 %v659_v49 }
  0xbc   : > { %v364_v50 = vpop.f32.mrf.mxu0 }
  0xbd   : > { %420 = vst [vmem:[%s965_s25] sm:$0xff] %v364_v50  ;;  %v383_v51 = vpop.f32.mrf.mxu1 }
  0xbe   : > { %421 = vst [vmem:[%s965_s25 + $0x8] sm:$0xff] %v383_v51 }
  0xc2   : > { %v369_v52 = vpop.f32.mrf.mxu2 }
  0xc3   : > { %424 = vst [vmem:[%s965_s25 + $0x20] sm:$0xff] %v369_v52  ;;  %v388_v53 = vpop.f32.mrf.mxu3 }
  0xc4   : > { %425 = vst [vmem:[%s965_s25 + $0x28] sm:$0xff] %v388_v53  ;;  %v366_v54 = vpop.f32.mrf.mxu0  ;;  %v453_v58 = vld [vmem:[%s965_s25] sm:$0xff] (%p901_p9) }
  0xc5   : > { %422 = vst [vmem:[%s965_s25 + $0x10] sm:$0xff] %v366_v54  ;;  %v385_v55 = vpop.f32.mrf.mxu1  ;;  %v455_v59 = vld [vmem:[%s965_s25 + $0x8] sm:$0xff] (%p901_p9) }
  0xc6   : > { %423 = vst [vmem:[%s965_s25 + $0x18] sm:$0xff] %v385_v55 }
  0xc7   : > { %454 = vst [vmem:[%s440_s29] sm:$0xff] (%p901_p9), %v453_v58 }
  0xc8   : > { %434 = sbr.rel (!%p901_p9) target bundleno = 213 (0xd5), region = 44  ;;  %456 = vst [vmem:[%s440_s29 + $0x8] sm:$0xff] (%p901_p9), %v455_v59 }
  0xca   : > { %v371_v56 = vpop.f32.mrf.mxu2  ;;  %v461_v62 = vld [vmem:[%s965_s25 + $0x20] sm:$0xff] (%p901_p9) }
  0xcb   : > { %426 = vst [vmem:[%s965_s25 + $0x30] sm:$0xff] %v371_v56  ;;  %v390_v57 = vpop.f32.mrf.mxu3  ;;  %v463_v63 = vld [vmem:[%s965_s25 + $0x28] sm:$0xff] (%p901_p9) }
  0xcc   : > { %427 = vst [vmem:[%s965_s25 + $0x38] sm:$0xff] %v390_v57  ;;  %v457_v60 = vld [vmem:[%s965_s25 + $0x10] sm:$0xff] (%p901_p9) }
  0xcd   : > { %v459_v61 = vld [vmem:[%s965_s25 + $0x18] sm:$0xff]  ;;  %458 = vst [vmem:[%s440_s29 + $0x80] sm:$0xff] %v457_v60 }
  0xce   : > { %460 = vst [vmem:[%s440_s29 + $0x88] sm:$0xff] %v459_v61 }
  0xcf   : > { %462 = vst [vmem:[%s440_s29 + $0x100] sm:$0xff] %v461_v62 }
  0xd0   : > { %464 = vst [vmem:[%s440_s29 + $0x108] sm:$0xff] %v463_v63 }
  0xd2   : > { %v465_v0 = vld [vmem:[%s965_s25 + $0x30] sm:$0xff] }
  0xd3   : > { %v467_v1 = vld [vmem:[%s965_s25 + $0x38] sm:$0xff]  ;;  %466 = vst [vmem:[%s440_s29 + $0x180] sm:$0xff] %v465_v0 }
  0xd4   : > { %468 = vst [vmem:[%s440_s29 + $0x188] sm:$0xff] %v467_v1 }
  0xd5 PF: > { %s15_s14 = sadd.s32 1, %s831_s14   ;;  %s1013_s9 = smov %s815_s10 }
  0xd6   : > { %p12_p1 = scmp.ge.s32.totalorder %s15_s14, 10   ;;  %s1014_s10 = smov %s819_s11 }
  0xd7   : > { %s1015_s11 = smov %s899_s21  ;;  %s1016_s12 = smov %s827_s13 }
  0xd8   : > { %s1017_s13 = smov %s1019_s16  ;;  %14 = sbr.rel (!%p12_p1) target bundleno = 4 (0x4), region = 102 }
  0xdd   :  { %484 = vsyncpa [#allocation4], 1 }
  0xde   :  { %486 = vsyncpa [#allocation4 + $0x1], 1 }

// kernel: _lambda_.10
= control target key start
LH: loop header
LB: loop body
LE: loop exit
PB: predicated region body
PF: predicated region fallthrough
CT: control target
= control target key end

     0   :  { %s107_s0 = inlined_call_operand.vmem [shape: f32[32,128], index: 0, kind: input, shape index: {}]   ;;  %s108_s1 = inlined_call_operand.vmem [shape: f32[1,128], index: 1, kind: input, shape index: {}]   ;;  %s109_s2 = inlined_call_operand.vmem [shape: f32[1,128], index: 2, kind: input, shape index: {}]   ;;  %s110_s3 = inlined_call_operand.vmem [shape: bf16[32,128], index: 3, kind: output, shape index: {}]  }
   0x1   :  { %v14_v0 = vld [vmem:[%s107_s0] sm:$0xff]  ;;  %v15_v1 = vld [vmem:[%s107_s0 + $0x8] sm:$0xff]  ;;  %v16_v4 = vld [vmem:[%s107_s0 + $0x10] sm:$0xff] }
   0x2   :  { %v61_v2 = vld [vmem:[%s108_s1] ss:$0 sm:$0xff]  ;;  %v17_v5 = vld [vmem:[%s107_s0 + $0x18] sm:$0xff] }
   0x3   :  { %v62_v3 = vld [vmem:[%s109_s2] ss:$0 sm:$0xff]  ;;  %v22_v6 = vmul.f32 %v61_v2, %v14_v0  ;;  %v23_v7 = vmul.f32 %v61_v2, %v15_v1  ;;  %v24_v8 = vmul.f32 %v61_v2, %v16_v4  ;;  %v25_v9 = vmul.f32 %v61_v2, %v17_v5 }
   0x5   :  { %v30_v10 = vadd.f32 %v62_v3, %v22_v6  ;;  %v31_v11 = vadd.f32 %v62_v3, %v23_v7  ;;  %v32_v12 = vadd.f32 %v62_v3, %v24_v8  ;;  %v33_v13 = vadd.f32 %v62_v3, %v25_v9 }
   0x7   :  { %v34_v14 = vmax.f32 %v30_v10, 0.0  ;;  %v35_v15 = vmax.f32 %v31_v11, 0.0  ;;  %v36_v16 = vmax.f32 %v32_v12, 0.0  ;;  %v37_v17 = vmax.f32 %v33_v13, 0.0 }
   0x9   :  { %v53_v18 = vpack.c.bf16 %v35_v15, %v34_v14  ;;  %v58_v19 = vpack.c.bf16 %v37_v17, %v36_v16 }
   0xb   :  { %54 = vst [vmem:[%s110_s3] sm:$0xff] %v53_v18  }
   0xc   :  { %60 = vst [vmem:[%s110_s3 + $0x8] sm:$0xff] %v58_v19  }

// kernel: _lambda_.12
= control target key start
LH: loop header
LB: loop body
LE: loop exit
PB: predicated region body
PF: predicated region fallthrough
CT: control target
= control target key end

     0   :  { %v105_v0 = vmov 0.0   ;;  %s187_s1 = inlined_call_operand.vmem [shape: f32[1,128], index: 1, kind: output, shape index: {0}]   ;;  %s188_s2 = inlined_call_operand.vmem [shape: f32[1,128], index: 2, kind: output, shape index: {1}]   ;;  %s189_s0 = inlined_call_operand.vmem [shape: f32[128,128], index: 0, kind: input, shape index: {}]  }
   0x1   :  { %14 = vst [vmem:[%s187_s1] sm:$0x1] %v105_v0  ;;  %v16_v1 = vld [vmem:[%s189_s0] sm:$0xff]  ;;  %v17_v2 = vld [vmem:[%s189_s0 + $0x8] sm:$0xff]  ;;  %v18_v3 = vld [vmem:[%s189_s0 + $0x10] sm:$0xff] }
   0x2   :  { %15 = vst [vmem:[%s188_s2] sm:$0x1] %v105_v0  ;;  %v19_v4 = vld [vmem:[%s189_s0 + $0x18] sm:$0xff]  ;;  %v33_v5 = vadd.f32 %v17_v2, %v16_v1  ;;  %v57_v6 = vmul.f32 %v16_v1, %v16_v1  ;;  %v58_v7 = vmul.f32 %v17_v2, %v17_v2  ;;  %v59_v8 = vmul.f32 %v18_v3, %v18_v3  ;;  %v20_v9 = vld [vmem:[%s189_s0 + $0x20] sm:$0xff]  ;;  %v21_v13 = vld [vmem:[%s189_s0 + $0x28] sm:$0xff] }
   0x3   :  { %v60_v11 = vmul.f32 %v19_v4, %v19_v4  ;;  %v61_v15 = vmul.f32 %v20_v9, %v20_v9  ;;  %v22_v17 = vld [vmem:[%s189_s0 + $0x30] sm:$0xff]  ;;  %v62_v19 = vmul.f32 %v21_v13, %v21_v13  ;;  %v23_v21 = vld [vmem:[%s189_s0 + $0x38] sm:$0xff]  ;;  %v24_v25 = vld [vmem:[%s189_s0 + $0x40] sm:$0xff] }
   0x4   :  { %v34_v10 = vadd.f32 %v33_v5, %v18_v3  ;;  %v73_v12 = vadd.f32 %v58_v7, %v57_v6  ;;  %v63_v23 = vmul.f32 %v22_v17, %v22_v17  ;;  %v64_v27 = vmul.f32 %v23_v21, %v23_v21  ;;  %v25_v29 = vld [vmem:[%s189_s0 + $0x48] sm:$0xff]  ;;  %v26_v33 = vld [vmem:[%s189_s0 + $0x50] sm:$0xff]  ;;  %v27_v37 = vld [vmem:[%s189_s0 + $0x58] sm:$0xff] }
   0x5   :  { %v65_v31 = vmul.f32 %v24_v25, %v24_v25  ;;  %v66_v35 = vmul.f32 %v25_v29, %v25_v29  ;;  %v67_v39 = vmul.f32 %v26_v33, %v26_v33  ;;  %v28_v41 = vld [vmem:[%s189_s0 + $0x60] sm:$0xff]  ;;  %v68_v43 = vmul.f32 %v27_v37, %v27_v37  ;;  %v29_v45 = vld [vmem:[%s189_s0 + $0x68] sm:$0xff]  ;;  %v30_v49 = vld [vmem:[%s189_s0 + $0x70] sm:$0xff] }
   0x6   :  { %v35_v14 = vadd.f32 %v34_v10, %v19_v4  ;;  %v74_v16 = vadd.f32 %v73_v12, %v59_v8  ;;  %v69_v47 = vmul.f32 %v28_v41, %v28_v41  ;;  %v70_v51 = vmul.f32 %v29_v45, %v29_v45  ;;  %v31_v53 = vld [vmem:[%s189_s0 + $0x78] sm:$0xff] }
   0x7   :  { %v71_v55 = vmul.f32 %v30_v49, %v30_v49  ;;  %v72_v58 = vmul.f32 %v31_v53, %v31_v53 }
   0x8   :  { %v36_v18 = vadd.f32 %v35_v14, %v20_v9  ;;  %v75_v20 = vadd.f32 %v74_v16, %v60_v11  ;;  %v32_v7 = vld [vmem:[%s187_s1] sm:$0x1] }
   0x9   :  { %v56_v12 = vld [vmem:[%s188_s2] sm:$0x1] }
   0xa   :  { %v37_v22 = vadd.f32 %v36_v18, %v21_v13  ;;  %v76_v24 = vadd.f32 %v75_v20, %v61_v15 }
   0xc   :  { %v38_v26 = vadd.f32 %v37_v22, %v22_v17  ;;  %v77_v28 = vadd.f32 %v76_v24, %v62_v19 }
   0xe   :  { %v39_v30 = vadd.f32 %v38_v26, %v23_v21  ;;  %v78_v32 = vadd.f32 %v77_v28, %v63_v23 }
  0x10   :  { %v40_v34 = vadd.f32 %v39_v30, %v24_v25  ;;  %v79_v36 = vadd.f32 %v78_v32, %v64_v27 }
  0x12   :  { %v41_v38 = vadd.f32 %v40_v34, %v25_v29  ;;  %v80_v40 = vadd.f32 %v79_v36, %v65_v31 }
  0x14   :  { %v42_v42 = vadd.f32 %v41_v38, %v26_v33  ;;  %v81_v44 = vadd.f32 %v80_v40, %v66_v35 }
  0x16   :  { %v43_v46 = vadd.f32 %v42_v42, %v27_v37  ;;  %v82_v48 = vadd.f32 %v81_v44, %v67_v39 }
  0x18   :  { %v44_v50 = vadd.f32 %v43_v46, %v28_v41  ;;  %v83_v52 = vadd.f32 %v82_v48, %v68_v43 }
  0x1a   :  { %v45_v54 = vadd.f32 %v44_v50, %v29_v45  ;;  %v84_v56 = vadd.f32 %v83_v52, %v69_v47 }
  0x1c   :  { %v46_v57 = vadd.f32 %v45_v54, %v30_v49  ;;  %v85_v59 = vadd.f32 %v84_v56, %v70_v51 }
  0x1e   :  { %v47_v60 = vadd.f32 %v46_v57, %v31_v53  ;;  %v86_v61 = vadd.f32 %v85_v59, %v71_v55 }
  0x20   :  { %v48_v62 = vrot.slane %v47_v60, 4  ;;  %v87_v63 = vadd.f32 %v86_v61, %v72_v58 }
  0x22   :  { %v49_v0 = vadd.f32 %v48_v62, %v47_v60  ;;  %v88_v1 = vrot.slane %v87_v63, 4 }
  0x24   :  { %v50_v2 = vrot.slane %v49_v0, 2  ;;  %v89_v3 = vadd.f32 %v88_v1, %v87_v63 }
  0x26   :  { %v51_v4 = vadd.f32 %v50_v2, %v49_v0  ;;  %v90_v5 = vrot.slane %v89_v3, 2 }
  0x28   :  { %v52_v6 = vrot.slane %v51_v4, 1  ;;  %v91_v8 = vadd.f32 %v90_v5, %v89_v3 }
  0x2a   :  { %v53_v9 = vadd.f32 %v52_v6, %v51_v4  ;;  %v92_v10 = vrot.slane %v91_v8, 1 }
  0x2c   :  { %v54_v11 = vadd.f32 %v53_v9, %v32_v7  ;;  %v93_v13 = vadd.f32 %v92_v10, %v91_v8 }
  0x2e   :  { %55 = vst [vmem:[%s187_s1] sm:$0x1] %v54_v11  ;;  %v94_v14 = vadd.f32 %v93_v13, %v56_v12 }
  0x30   :  { %95 = vst [vmem:[%s188_s2] sm:$0x1] %v94_v14 }

// kernel: _lambda_.13
= control target key start
LH: loop header
LB: loop body
LE: loop exit
PB: predicated region body
PF: predicated region fallthrough
CT: control target
= control target key end

     0   :  { %s287_s0 = inlined_call_operand.vmem [shape: f32[128,128], index: 0, kind: input, shape index: {}]   ;;  %s288_s1 = inlined_call_operand.vmem [shape: f32[1,128], index: 1, kind: input, shape index: {}]   ;;  %s289_s2 = inlined_call_operand.vmem [shape: f32[1,128], index: 2, kind: input, shape index: {}]   ;;  %s290_s3 = inlined_call_operand.vmem [shape: bf16[128,128], index: 3, kind: output, shape index: {}]  }
   0x1   :  { %v14_v0 = vld [vmem:[%s287_s0] sm:$0xff]  ;;  %v15_v1 = vld [vmem:[%s287_s0 + $0x8] sm:$0xff]  ;;  %v16_v4 = vld [vmem:[%s287_s0 + $0x10] sm:$0xff] }
   0x2   :  { %v169_v2 = vld [vmem:[%s288_s1] ss:$0 sm:$0xff]  ;;  %v17_v5 = vld [vmem:[%s287_s0 + $0x18] sm:$0xff]  ;;  %v19_v11 = vld [vmem:[%s287_s0 + $0x28] sm:$0xff] }
   0x3   :  { %v203_v3 = vld [vmem:[%s289_s2] ss:$0 sm:$0xff]  ;;  %v34_v7 = vmul.f32 %v169_v2, %v14_v0  ;;  %v35_v8 = vmul.f32 %v169_v2, %v15_v1  ;;  %v36_v9 = vmul.f32 %v169_v2, %v16_v4  ;;  %v37_v10 = vmul.f32 %v169_v2, %v17_v5  ;;  %v20_v12 = vld [vmem:[%s287_s0 + $0x30] sm:$0xff]  ;;  %v21_v13 = vld [vmem:[%s287_s0 + $0x38] sm:$0xff] }
   0x4   :  { %v18_v6 = vld [vmem:[%s287_s0 + $0x20] sm:$0xff]  ;;  %v39_v15 = vmul.f32 %v169_v2, %v19_v11  ;;  %v40_v16 = vmul.f32 %v169_v2, %v20_v12  ;;  %v41_v17 = vmul.f32 %v169_v2, %v21_v13  ;;  %v23_v27 = vld [vmem:[%s287_s0 + $0x48] sm:$0xff]  ;;  %v24_v32 = vld [vmem:[%s287_s0 + $0x50] sm:$0xff] }
   0x5   :  { %v38_v14 = vmul.f32 %v169_v2, %v18_v6  ;;  %v54_v18 = vadd.f32 %v203_v3, %v34_v7  ;;  %v55_v19 = vadd.f32 %v203_v3, %v35_v8  ;;  %v56_v20 = vadd.f32 %v203_v3, %v36_v9  ;;  %v22_v26 = vld [vmem:[%s287_s0 + $0x40] sm:$0xff]  ;;  %v25_v33 = vld [vmem:[%s287_s0 + $0x58] sm:$0xff]  ;;  %v27_v39 = vld [vmem:[%s287_s0 + $0x68] sm:$0xff] }
   0x6   :  { %v57_v21 = vadd.f32 %v203_v3, %v37_v10  ;;  %v59_v23 = vadd.f32 %v203_v3, %v39_v15  ;;  %v60_v24 = vadd.f32 %v203_v3, %v40_v16  ;;  %v61_v25 = vadd.f32 %v203_v3, %v41_v17  ;;  %v26_v38 = vld [vmem:[%s287_s0 + $0x60] sm:$0xff]  ;;  %v28_v44 = vld [vmem:[%s287_s0 + $0x70] sm:$0xff]  ;;  %v29_v45 = vld [vmem:[%s287_s0 + $0x78] sm:$0xff] }
   0x7   :  { %v58_v22 = vadd.f32 %v203_v3, %v38_v14  ;;  %v70_v28 = vmax.f32 %v54_v18, 0.0  ;;  %v71_v29 = vmax.f32 %v55_v19, 0.0  ;;  %v72_v30 = vmax.f32 %v56_v20, 0.0 }
   0x8   :  { %v73_v31 = vmax.f32 %v57_v21, 0.0  ;;  %v75_v35 = vmax.f32 %v59_v23, 0.0  ;;  %v76_v36 = vmax.f32 %v60_v24, 0.0  ;;  %v77_v37 = vmax.f32 %v61_v25, 0.0 }
   0x9   :  { %v74_v34 = vmax.f32 %v58_v22, 0.0  ;;  %v125_v40 = vpack.c.bf16 %v71_v29, %v70_v28  ;;  %v42_v42 = vmul.f32 %v169_v2, %v22_v26  ;;  %v43_v43 = vmul.f32 %v169_v2, %v23_v27 }
   0xa   :  { %v130_v41 = vpack.c.bf16 %v73_v31, %v72_v30  ;;  %v140_v47 = vpack.c.bf16 %v77_v37, %v76_v36  ;;  %v44_v48 = vmul.f32 %v169_v2, %v24_v32  ;;  %v45_v49 = vmul.f32 %v169_v2, %v25_v33 }
   0xb   :  { %v135_v46 = vpack.c.bf16 %v75_v35, %v74_v34  ;;  %126 = vst [vmem:[%s290_s3] sm:$0xff] %v125_v40   ;;  %v62_v50 = vadd.f32 %v203_v3, %v42_v42  ;;  %v63_v51 = vadd.f32 %v203_v3, %v43_v43  ;;  %v46_v52 = vmul.f32 %v169_v2, %v26_v38 }
   0xc   :  { %v47_v53 = vmul.f32 %v169_v2, %v27_v39  ;;  %162 = vst [vmem:[%s290_s3 + $0x8] sm:$0xff] %v130_v41   ;;  %v64_v54 = vadd.f32 %v203_v3, %v44_v48  ;;  %v65_v55 = vadd.f32 %v203_v3, %v45_v49  ;;  %v48_v56 = vmul.f32 %v169_v2, %v28_v44 }
   0xd   :  { %v49_v57 = vmul.f32 %v169_v2, %v29_v45  ;;  %163 = vst [vmem:[%s290_s3 + $0x10] sm:$0xff] %v135_v46   ;;  %v78_v58 = vmax.f32 %v62_v50, 0.0  ;;  %v79_v59 = vmax.f32 %v63_v51, 0.0  ;;  %v66_v60 = vadd.f32 %v203_v3, %v46_v52 }
   0xe   :  { %v67_v61 = vadd.f32 %v203_v3, %v47_v53  ;;  %164 = vst [vmem:[%s290_s3 + $0x18] sm:$0xff] %v140_v47   ;;  %v80_v62 = vmax.f32 %v64_v54, 0.0  ;;  %v81_v63 = vmax.f32 %v65_v55, 0.0  ;;  %v68_v0 = vadd.f32 %v203_v3, %v48_v56 }
   0xf   :  { %v69_v1 = vadd.f32 %v203_v3, %v49_v57  ;;  %v145_v2 = vpack.c.bf16 %v79_v59, %v78_v58  ;;  %v82_v4 = vmax.f32 %v66_v60, 0.0 }
  0x10   :  { %v83_v5 = vmax.f32 %v67_v61, 0.0  ;;  %v150_v6 = vpack.c.bf16 %v81_v63, %v80_v62  ;;  %v84_v7 = vmax.f32 %v68_v0, 0.0 }
  0x11   :  { %v85_v8 = vmax.f32 %v69_v1, 0.0  ;;  %165 = vst [vmem:[%s290_s3 + $0x20] sm:$0xff] %v145_v2  }
  0x12   :  { %v155_v9 = vpack.c.bf16 %v83_v5, %v82_v4  ;;  %166 = vst [vmem:[%s290_s3 + $0x28] sm:$0xff] %v150_v6  }
  0x13   :  { %v160_v10 = vpack.c.bf16 %v85_v8, %v84_v7 }
  0x14   :  { %167 = vst [vmem:[%s290_s3 + $0x30] sm:$0xff] %v155_v9  }
  0x15   :  { %168 = vst [vmem:[%s290_s3 + $0x38] sm:$0xff] %v160_v10  }

// kernel: _lambda_.14
= control target key start
LH: loop header
LB: loop body
LE: loop exit
PB: predicated region body
PF: predicated region fallthrough
CT: control target
= control target key end

     0   :  { %s1187_s9 = smov 0   ;;  %s1189_s10 = smov 0   ;;  %s1439_s0 = inlined_call_operand.vmem [shape: bf16[128,128], index: 0, kind: input, shape index: {}]   ;;  %s1440_s1 = inlined_call_operand.vmem [shape: bf16[128,2048], index: 1, kind: input, shape index: {}]   ;;  %s1441_s2 = inlined_call_operand.vmem [shape: f32[128,2048], index: 2, kind: output, shape index: {}]  }
   0x1   :  { %s1191_s11 = smov 0   ;;  %s1193_s12 = smov 0  }
   0x2   :  { %s1195_s13 = smov 0  }
   0x3 LB: > { %s27_s14 = sadd.s32 1, %s1166_s12  ;;  %s938_s15 = sadd.s32 4294967295, %s1170_s13   ;;  %s1170_s13 = sphi %s1195_s13, %s12_s13   ;;  %s1166_s12 = sphi %s1193_s12, %s1446_s12   ;;  %s1162_s11 = sphi %s1191_s11, %s1445_s11   ;;  %s1158_s10 = sphi %s1189_s10, %s1444_s10   ;;  %s1154_s9 = sphi %s1187_s9, %s1443_s9  }
   0x4   : > { %p29_p0 = scmp.ge.s32.totalorder %s27_s14, 8  ;;  %p75_p1 = scmp.ne.s32.totalorder %s1158_s10, %s1154_s9 }
   0x5   : > { %p76_p2 = scmp.eq.s32.totalorder %s1170_s13, 0  ;;  %p107_p4 = scmp.eq.s32.totalorder %s938_s15, 7 }
   0x6   : > { %s1448_s14 = smov (%p29_p0, %s27_s14), 0  ;;  %s68_s17 = sadd.s32 1, %s1158_s10 }
   0x7   : > { %p77_p3 = por %p76_p2, %p75_p1  ;;  %s64_s16 = ssub.s32 %s1166_s12, %s1448_s14 }
   0x8   : > { %p66_p5 = scmp.eq.s32.totalorder %s64_s16, 0  ;;  %p1222_p6 = por %p107_p4, %p75_p1 }
   0x9   : > { %p942_p7 = scmp.ge.s32.totalorder %s1170_s13, 8 }
   0xa   : > { %s1227_s19 = scalar_select %p66_p5, %s1158_s10, %s68_s17  }
   0xb   : > { %141 = sbr.rel (%p942_p7) target bundleno = 36 (0x24), region = 20 }
  0x10   : > { %144 = sbr.rel (!%p77_p3) target bundleno = 36 (0x24), region = 24  ;;  %s146_s20 = sand.u32 (%p77_p3), 1, %s1158_s10  }
  0x11   : > { %s1050_s21 = sshll.u32 (%p77_p3), %s1166_s12, 3  ;;  %s943_s22 = sshll.u32 (%p77_p3), %s146_s20, 7 }
  0x12   : > { %s1235_s25 = scalar_lea.vmem (%p77_p3), %s1440_s1, %s1050_s21  ;;  %s148_s26 = scalar_lea.vmem (%p77_p3), [#allocation3], %s943_s22 }
  0x13   : > { %v213_v0 = vld [vmem:[%s1235_s25] sm:$0xff] (%p77_p3) }
  0x14   : > { %v215_v1 = vld [vmem:[%s1235_s25 + $0x40] sm:$0xff] (%p77_p3)  ;;  %214 = vst [vmem:[%s148_s26] sm:$0xff] (%p77_p3), %v213_v0 }
  0x15   : > { %v217_v2 = vld [vmem:[%s1235_s25 + $0x80] sm:$0xff]  ;;  %216 = vst [vmem:[%s148_s26 + $0x8] sm:$0xff] %v215_v1 }
  0x16   : > { %v219_v3 = vld [vmem:[%s1235_s25 + $0xc0] sm:$0xff]  ;;  %218 = vst [vmem:[%s148_s26 + $0x10] sm:$0xff] %v217_v2 }
  0x17   : > { %v221_v4 = vld [vmem:[%s1235_s25 + $0x100] sm:$0xff]  ;;  %220 = vst [vmem:[%s148_s26 + $0x18] sm:$0xff] %v219_v3 }
  0x18   : > { %v223_v5 = vld [vmem:[%s1235_s25 + $0x140] sm:$0xff]  ;;  %222 = vst [vmem:[%s148_s26 + $0x20] sm:$0xff] %v221_v4 }
  0x19   : > { %v225_v6 = vld [vmem:[%s1235_s25 + $0x180] sm:$0xff]  ;;  %224 = vst [vmem:[%s148_s26 + $0x28] sm:$0xff] %v223_v5 }
  0x1a   : > { %v227_v7 = vld [vmem:[%s1235_s25 + $0x1c0] sm:$0xff]  ;;  %226 = vst [vmem:[%s148_s26 + $0x30] sm:$0xff] %v225_v6 }
  0x1b   : > { %v229_v8 = vld [vmem:[%s1235_s25 + $0x200] sm:$0xff]  ;;  %228 = vst [vmem:[%s148_s26 + $0x38] sm:$0xff] %v227_v7 }
  0x1c   : > { %v231_v9 = vld [vmem:[%s1235_s25 + $0x240] sm:$0xff]  ;;  %230 = vst [vmem:[%s148_s26 + $0x40] sm:$0xff] %v229_v8 }
  0x1d   : > { %v233_v10 = vld [vmem:[%s1235_s25 + $0x280] sm:$0xff]  ;;  %232 = vst [vmem:[%s148_s26 + $0x48] sm:$0xff] %v231_v9 }
  0x1e   : > { %v235_v11 = vld [vmem:[%s1235_s25 + $0x2c0] sm:$0xff]  ;;  %234 = vst [vmem:[%s148_s26 + $0x50] sm:$0xff] %v233_v10 }
  0x1f   : > { %v237_v12 = vld [vmem:[%s1235_s25 + $0x300] sm:$0xff]  ;;  %236 = vst [vmem:[%s148_s26 + $0x58] sm:$0xff] %v235_v11 }
  0x20   : > { %v239_v13 = vld [vmem:[%s1235_s25 + $0x340] sm:$0xff]  ;;  %238 = vst [vmem:[%s148_s26 + $0x60] sm:$0xff] %v237_v12 }
  0x21   : > { %v241_v14 = vld [vmem:[%s1235_s25 + $0x380] sm:$0xff]  ;;  %240 = vst [vmem:[%s148_s26 + $0x68] sm:$0xff] %v239_v13 }
  0x22   : > { %v243_v15 = vld [vmem:[%s1235_s25 + $0x3c0] sm:$0xff]  ;;  %242 = vst [vmem:[%s148_s26 + $0x70] sm:$0xff] %v241_v14 }
  0x23   : > { %244 = vst [vmem:[%s148_s26 + $0x78] sm:$0xff] %v243_v15 }
  0x24 PF: > { %p946_p8 = scmp.ge.s32.totalorder %s1170_s13, 1  ;;  %p249_p9 = scmp.lt.s32.totalorder %s1170_s13, 9 }
  0x26   : > { %p250_p10 = pnand %p946_p8, %p249_p9 }
  0x27   : > { %s256_s27 = sand.u32 (!%p250_p10), 1, %s1154_s9  }
  0x28   : > { %253 = sbr.rel (%p250_p10) target bundleno = 277 (0x115), region = 62  ;;  %s947_s28 = sshll.u32 (!%p250_p10), %s256_s27, 7 }
  0x29   : > { %s1258_s29 = scalar_lea.vmem (!%p250_p10), [#allocation3], %s947_s28  ;;  %s948_s26 = sshll.u32 (!%p250_p10), %s256_s27, 8 }
  0x2a   : > { %s1318_s28 = scalar_lea.vmem (!%p250_p10), [#allocation4], %s948_s26 }
  0x2d   : > { %v1039_v16 = vld [vmem:[%s1258_s29 + $0x70] sm:$0xf]  ;;  %v1074_v17 = vld [vmem:[%s1258_s29 + $0x74] sm:$0xf0]  ;;  %v1073_v18 = vld [vmem:[%s1258_s29 + $0x74] sm:$0xf] }
  0x2e   : > { %v1040_v19 = vor.u32 %v1074_v17, %v1039_v16  ;;  %v1041_v20 = vld [vmem:[%s1258_s29 + $0x78] sm:$0xf0]  ;;  %v1031_v21 = vld [vmem:[%s1258_s29 + $0x60] sm:$0xf]  ;;  %v1072_v22 = vld [vmem:[%s1258_s29 + $0x64] sm:$0xf0] }
  0x2f   : > { %v1044_v23 = vor.u32 %v1073_v18, %v1041_v20  ;;  %v1071_v24 = vld [vmem:[%s1258_s29 + $0x64] sm:$0xf]  ;;  %v1033_v25 = vld [vmem:[%s1258_s29 + $0x68] sm:$0xf0]  ;;  %v1032_v26 = vor.u32 %v1072_v22, %v1031_v21  ;;  %v1023_v28 = vld [vmem:[%s1258_s29 + $0x50] sm:$0xf] }
  0x30   : > { %525 = vmatpush.bf16.msra.mxu0 %v1040_v19  ;;  %1076 = vmatpush.bf16.msra.mxu2 %v1040_v19  ;;  %v1036_v27 = vor.u32 %v1071_v24, %v1033_v25  ;;  %v1070_v29 = vld [vmem:[%s1258_s29 + $0x54] sm:$0xf0]  ;;  %v1069_v30 = vld [vmem:[%s1258_s29 + $0x54] sm:$0xf]  ;;  %v1025_v31 = vld [vmem:[%s1258_s29 + $0x58] sm:$0xf0] }
  0x31   : > { %574 = vmatpush.bf16.msra.mxu1 %v1044_v23  ;;  %1084 = vmatpush.bf16.msra.mxu3 %v1044_v23  ;;  %v1024_v32 = vor.u32 %v1070_v29, %v1023_v28  ;;  %v1028_v33 = vor.u32 %v1069_v30, %v1025_v31  ;;  %v1015_v34 = vld [vmem:[%s1258_s29 + $0x40] sm:$0xf]  ;;  %v1068_v35 = vld [vmem:[%s1258_s29 + $0x44] sm:$0xf0]  ;;  %v1067_v36 = vld [vmem:[%s1258_s29 + $0x44] sm:$0xf] }
  0x32   : > { %v1017_v37 = vld [vmem:[%s1258_s29 + $0x48] sm:$0xf0]  ;;  %v1016_v38 = vor.u32 %v1068_v35, %v1015_v34  ;;  %v1007_v40 = vld [vmem:[%s1258_s29 + $0x30] sm:$0xf]  ;;  %v1066_v41 = vld [vmem:[%s1258_s29 + $0x34] sm:$0xf0] }
  0x33   : > { %v1020_v39 = vor.u32 %v1067_v36, %v1017_v37  ;;  %v1065_v42 = vld [vmem:[%s1258_s29 + $0x34] sm:$0xf]  ;;  %v1009_v43 = vld [vmem:[%s1258_s29 + $0x38] sm:$0xf0]  ;;  %v1008_v44 = vor.u32 %v1066_v41, %v1007_v40  ;;  %v999_v46 = vld [vmem:[%s1258_s29 + $0x20] sm:$0xf] }
  0x34   : > { %526 = vmatpush.bf16.msra.mxu0 %v1032_v26  ;;  %1077 = vmatpush.bf16.msra.mxu2 %v1032_v26  ;;  %v1012_v45 = vor.u32 %v1065_v42, %v1009_v43  ;;  %v1064_v47 = vld [vmem:[%s1258_s29 + $0x24] sm:$0xf0]  ;;  %v1063_v48 = vld [vmem:[%s1258_s29 + $0x24] sm:$0xf]  ;;  %v1001_v49 = vld [vmem:[%s1258_s29 + $0x28] sm:$0xf0] }
  0x35   : > { %575 = vmatpush.bf16.msra.mxu1 %v1036_v27  ;;  %1085 = vmatpush.bf16.msra.mxu3 %v1036_v27  ;;  %v1000_v50 = vor.u32 %v1064_v47, %v999_v46  ;;  %v1004_v51 = vor.u32 %v1063_v48, %v1001_v49  ;;  %v991_v52 = vld [vmem:[%s1258_s29 + $0x10] sm:$0xf]  ;;  %v1062_v53 = vld [vmem:[%s1258_s29 + $0x14] sm:$0xf0]  ;;  %v1061_v54 = vld [vmem:[%s1258_s29 + $0x14] sm:$0xf] }
  0x36   : > { %v993_v55 = vld [vmem:[%s1258_s29 + $0x18] sm:$0xf0]  ;;  %v992_v56 = vor.u32 %v1062_v53, %v991_v52  ;;  %v983_v58 = vld [vmem:[%s1258_s29] sm:$0xf]  ;;  %v1060_v59 = vld [vmem:[%s1258_s29 + $0x4] sm:$0xf0] }
  0x37   : > { %v996_v57 = vor.u32 %v1061_v54, %v993_v55  ;;  %v1059_v60 = vld [vmem:[%s1258_s29 + $0x4] sm:$0xf]  ;;  %v985_v61 = vld [vmem:[%s1258_s29 + $0x8] sm:$0xf0]  ;;  %v984_v62 = vor.u32 %v1060_v59, %v983_v58  ;;  %v1053_v4 = vld [vmem:[%s1439_s0 + $0x10] sm:$0xff]  ;;  %s1075_s9 = sshll.u32 (%p1222_p6), %s1162_s11, 4 }
  0x38   : > { %527 = vmatpush.bf16.msra.mxu0 %v1024_v32  ;;  %1078 = vmatpush.bf16.msra.mxu2 %v1024_v32  ;;  %v988_v63 = vor.u32 %v1059_v60, %v985_v61  ;;  %v1051_v0 = vld [vmem:[%s1439_s0] sm:$0xff]  ;;  %v1052_v2 = vld [vmem:[%s1439_s0 + $0x8] sm:$0xff]  ;;  %v1057_v5 = vld [vmem:[%s1439_s0 + $0x30] sm:$0xff]  ;;  %s1360_s30 = scalar_lea.vmem (%p1222_p6), %s1441_s2, %s1075_s9 }
  0x39   : > { %576 = vmatpush.bf16.msra.mxu1 %v1028_v33  ;;  %1086 = vmatpush.bf16.msra.mxu3 %v1028_v33  ;;  %v1055_v1 = vld [vmem:[%s1439_s0 + $0x20] sm:$0xff]  ;;  %v1056_v3 = vld [vmem:[%s1439_s0 + $0x28] sm:$0xff]  ;;  %v1054_v6 = vld [vmem:[%s1439_s0 + $0x18] sm:$0xff] }
  0x3a   : > { %v1058_v7 = vld [vmem:[%s1439_s0 + $0x38] sm:$0xff] }
  0x3c   : > { %528 = vmatpush.bf16.msra.mxu0 %v1016_v38  ;;  %1079 = vmatpush.bf16.msra.mxu2 %v1016_v38 }
  0x3d   : > { %577 = vmatpush.bf16.msra.mxu1 %v1020_v39  ;;  %1087 = vmatpush.bf16.msra.mxu3 %v1020_v39 }
  0x40   : > { %529 = vmatpush.bf16.msra.mxu0 %v1008_v44  ;;  %1080 = vmatpush.bf16.msra.mxu2 %v1008_v44 }
  0x41   : > { %578 = vmatpush.bf16.msra.mxu1 %v1012_v45  ;;  %1088 = vmatpush.bf16.msra.mxu3 %v1012_v45 }
  0x44   : > { %530 = vmatpush.bf16.msra.mxu0 %v1000_v50  ;;  %1081 = vmatpush.bf16.msra.mxu2 %v1000_v50 }
  0x45   : > { %579 = vmatpush.bf16.msra.mxu1 %v1004_v51  ;;  %1089 = vmatpush.bf16.msra.mxu3 %v1004_v51 }
  0x48   : > { %531 = vmatpush.bf16.msra.mxu0 %v992_v56  ;;  %1082 = vmatpush.bf16.msra.mxu2 %v992_v56 }
  0x49   : > { %580 = vmatpush.bf16.msra.mxu1 %v996_v57  ;;  %1090 = vmatpush.bf16.msra.mxu3 %v996_v57 }
  0x4c   : > { %532 = vmatpush.bf16.msra.mxu0 %v984_v62  ;;  %1083 = vmatpush.bf16.msra.mxu2 %v984_v62 }
  0x4d   : > { %581 = vmatpush.bf16.msra.mxu1 %v988_v63  ;;  %1091 = vmatpush.bf16.msra.mxu3 %v988_v63 }
  0x4f   : > { %533 = vmatmul.bf16.vlgmr.msra.gmra.mxu0 %v1051_v0  ;;  %553 = vmatmul.bf16.vlgmr.msra.gmra.mxu2 %v1055_v1 }
  0x50   : > { %582 = vmatmul.bf16.vlgmr.msra.gmra.mxu1 %v1051_v0  ;;  %602 = vmatmul.bf16.vlgmr.msra.gmra.mxu3 %v1055_v1 }
  0x5f   : > { %538 = vmatmul.bf16.gmra.mxu0 %v1052_v2  ;;  %558 = vmatmul.bf16.gmra.mxu2 %v1056_v3 }
  0x60   : > { %587 = vmatmul.bf16.gmra.mxu1 %v1052_v2  ;;  %607 = vmatmul.bf16.gmra.mxu3 %v1056_v3 }
  0x6f   : > { %543 = vmatmul.bf16.gmra.mxu0 %v1053_v4  ;;  %563 = vmatmul.bf16.gmra.mxu2 %v1057_v5 }
  0x70   : > { %592 = vmatmul.bf16.gmra.mxu1 %v1053_v4  ;;  %612 = vmatmul.bf16.gmra.mxu3 %v1057_v5 }
  0x7f   : > { %548 = vmatmul.bf16.gmra.mxu0 %v1054_v6  ;;  %568 = vmatmul.bf16.gmra.mxu2 %v1058_v7 }
  0x80   : > { %597 = vmatmul.bf16.gmra.mxu1 %v1054_v6  ;;  %617 = vmatmul.bf16.gmra.mxu3 %v1058_v7 }
  0xcc   : > { %v534_v8 = vpop.f32.mrf.mxu0 }
  0xcd   : > { %722 = vst [vmem:[%s1318_s28] sm:$0xff] %v534_v8  ;;  %v583_v9 = vpop.f32.mrf.mxu1 }
  0xce   : > { %723 = vst [vmem:[%s1318_s28 + $0x8] sm:$0xff] %v583_v9 }
  0xd2   : > { %v554_v10 = vpop.f32.mrf.mxu2 }
  0xd3   : > { %738 = vst [vmem:[%s1318_s28 + $0x80] sm:$0xff] %v554_v10  ;;  %v603_v11 = vpop.f32.mrf.mxu3 }
  0xd4   : > { %739 = vst [vmem:[%s1318_s28 + $0x88] sm:$0xff] %v603_v11  ;;  %v536_v12 = vpop.f32.mrf.mxu0  ;;  %v779_v40 = vld [vmem:[%s1318_s28] sm:$0xff] (%p1222_p6) }
  0xd5   : > { %724 = vst [vmem:[%s1318_s28 + $0x10] sm:$0xff] %v536_v12  ;;  %v585_v13 = vpop.f32.mrf.mxu1  ;;  %v781_v41 = vld [vmem:[%s1318_s28 + $0x8] sm:$0xff] (%p1222_p6) }
  0xd6   : > { %725 = vst [vmem:[%s1318_s28 + $0x18] sm:$0xff] %v585_v13 }
  0xd7   : > { %780 = vst [vmem:[%s1360_s30] sm:$0xff] (%p1222_p6), %v779_v40 }
  0xd8   : > { %782 = vst [vmem:[%s1360_s30 + $0x8] sm:$0xff] (%p1222_p6), %v781_v41 }
  0xda   : > { %v556_v14 = vpop.f32.mrf.mxu2  ;;  %v811_v56 = vld [vmem:[%s1318_s28 + $0x80] sm:$0xff] (%p1222_p6) }
  0xdb   : > { %740 = vst [vmem:[%s1318_s28 + $0x90] sm:$0xff] %v556_v14  ;;  %v605_v15 = vpop.f32.mrf.mxu3  ;;  %v813_v57 = vld [vmem:[%s1318_s28 + $0x88] sm:$0xff] (%p1222_p6) }
  0xdc   : > { %741 = vst [vmem:[%s1318_s28 + $0x98] sm:$0xff] %v605_v15  ;;  %v539_v16 = vpop.f32.mrf.mxu0  ;;  %v783_v42 = vld [vmem:[%s1318_s28 + $0x10] sm:$0xff] (%p1222_p6) }
  0xdd   : > { %726 = vst [vmem:[%s1318_s28 + $0x20] sm:$0xff] %v539_v16  ;;  %v588_v17 = vpop.f32.mrf.mxu1  ;;  %v785_v43 = vld [vmem:[%s1318_s28 + $0x18] sm:$0xff] (%p1222_p6) }
  0xde   : > { %727 = vst [vmem:[%s1318_s28 + $0x28] sm:$0xff] %v588_v17 }
  0xdf   : > { %784 = vst [vmem:[%s1360_s30 + $0x80] sm:$0xff] (%p1222_p6), %v783_v42 }
  0xe0   : > { %786 = vst [vmem:[%s1360_s30 + $0x88] sm:$0xff] (%p1222_p6), %v785_v43 }
  0xe1   : > { %812 = vst [vmem:[%s1360_s30 + $0x400] sm:$0xff] (%p1222_p6), %v811_v56 }
  0xe2   : > { %v559_v18 = vpop.f32.mrf.mxu2  ;;  %v815_v58 = vld [vmem:[%s1318_s28 + $0x90] sm:$0xff] (%p1222_p6)  ;;  %814 = vst [vmem:[%s1360_s30 + $0x408] sm:$0xff] (%p1222_p6), %v813_v57 }
  0xe3   : > { %742 = vst [vmem:[%s1318_s28 + $0xa0] sm:$0xff] %v559_v18  ;;  %v608_v19 = vpop.f32.mrf.mxu3  ;;  %v817_v59 = vld [vmem:[%s1318_s28 + $0x98] sm:$0xff] (%p1222_p6) }
  0xe4   : > { %743 = vst [vmem:[%s1318_s28 + $0xa8] sm:$0xff] %v608_v19  ;;  %v541_v20 = vpop.f32.mrf.mxu0  ;;  %v787_v44 = vld [vmem:[%s1318_s28 + $0x20] sm:$0xff] (%p1222_p6) }
  0xe5   : > { %728 = vst [vmem:[%s1318_s28 + $0x30] sm:$0xff] %v541_v20  ;;  %v590_v21 = vpop.f32.mrf.mxu1  ;;  %v789_v45 = vld [vmem:[%s1318_s28 + $0x28] sm:$0xff] (%p1222_p6) }
  0xe6   : > { %729 = vst [vmem:[%s1318_s28 + $0x38] sm:$0xff] %v590_v21 }
  0xe7   : > { %788 = vst [vmem:[%s1360_s30 + $0x100] sm:$0xff] (%p1222_p6), %v787_v44 }
  0xe8   : > { %790 = vst [vmem:[%s1360_s30 + $0x108] sm:$0xff] (%p1222_p6), %v789_v45 }
  0xe9   : > { %816 = vst [vmem:[%s1360_s30 + $0x480] sm:$0xff] (%p1222_p6), %v815_v58 }
  0xea   : > { %v561_v22 = vpop.f32.mrf.mxu2  ;;  %v819_v60 = vld [vmem:[%s1318_s28 + $0xa0] sm:$0xff] (%p1222_p6)  ;;  %818 = vst [vmem:[%s1360_s30 + $0x488] sm:$0xff] (%p1222_p6), %v817_v59 }
  0xeb   : > { %744 = vst [vmem:[%s1318_s28 + $0xb0] sm:$0xff] %v561_v22  ;;  %v610_v23 = vpop.f32.mrf.mxu3  ;;  %v821_v61 = vld [vmem:[%s1318_s28 + $0xa8] sm:$0xff] (%p1222_p6) }
  0xec   : > { %745 = vst [vmem:[%s1318_s28 + $0xb8] sm:$0xff] %v610_v23  ;;  %v544_v24 = vpop.f32.mrf.mxu0  ;;  %v791_v46 = vld [vmem:[%s1318_s28 + $0x30] sm:$0xff] (%p1222_p6) }
  0xed   : > { %730 = vst [vmem:[%s1318_s28 + $0x40] sm:$0xff] %v544_v24  ;;  %v593_v25 = vpop.f32.mrf.mxu1  ;;  %v793_v47 = vld [vmem:[%s1318_s28 + $0x38] sm:$0xff] (%p1222_p6) }
  0xee   : > { %731 = vst [vmem:[%s1318_s28 + $0x48] sm:$0xff] %v593_v25 }
  0xef   : > { %792 = vst [vmem:[%s1360_s30 + $0x180] sm:$0xff] (%p1222_p6), %v791_v46 }
  0xf0   : > { %794 = vst [vmem:[%s1360_s30 + $0x188] sm:$0xff] (%p1222_p6), %v793_v47 }
  0xf1   : > { %820 = vst [vmem:[%s1360_s30 + $0x500] sm:$0xff] (%p1222_p6), %v819_v60 }
  0xf2   : > { %v564_v26 = vpop.f32.mrf.mxu2  ;;  %v823_v62 = vld [vmem:[%s1318_s28 + $0xb0] sm:$0xff] (%p1222_p6)  ;;  %822 = vst [vmem:[%s1360_s30 + $0x508] sm:$0xff] (%p1222_p6), %v821_v61 }
  0xf3   : > { %746 = vst [vmem:[%s1318_s28 + $0xc0] sm:$0xff] %v564_v26  ;;  %v613_v27 = vpop.f32.mrf.mxu3  ;;  %v825_v63 = vld [vmem:[%s1318_s28 + $0xb8] sm:$0xff] (%p1222_p6) }
  0xf4   : > { %747 = vst [vmem:[%s1318_s28 + $0xc8] sm:$0xff] %v613_v27  ;;  %v546_v28 = vpop.f32.mrf.mxu0  ;;  %v795_v48 = vld [vmem:[%s1318_s28 + $0x40] sm:$0xff] (%p1222_p6) }
  0xf5   : > { %732 = vst [vmem:[%s1318_s28 + $0x50] sm:$0xff] %v546_v28  ;;  %v595_v29 = vpop.f32.mrf.mxu1  ;;  %v797_v49 = vld [vmem:[%s1318_s28 + $0x48] sm:$0xff] (%p1222_p6) }
  0xf6   : > { %733 = vst [vmem:[%s1318_s28 + $0x58] sm:$0xff] %v595_v29 }
  0xf7   : > { %796 = vst [vmem:[%s1360_s30 + $0x200] sm:$0xff] (%p1222_p6), %v795_v48 }
  0xf8   : > { %798 = vst [vmem:[%s1360_s30 + $0x208] sm:$0xff] (%p1222_p6), %v797_v49 }
  0xf9   : > { %824 = vst [vmem:[%s1360_s30 + $0x580] sm:$0xff] (%p1222_p6), %v823_v62 }
  0xfa   : > { %v566_v30 = vpop.f32.mrf.mxu2  ;;  %v827_v0 = vld [vmem:[%s1318_s28 + $0xc0] sm:$0xff] (%p1222_p6)  ;;  %826 = vst [vmem:[%s1360_s30 + $0x588] sm:$0xff] (%p1222_p6), %v825_v63 }
  0xfb   : > { %748 = vst [vmem:[%s1318_s28 + $0xd0] sm:$0xff] %v566_v30  ;;  %v615_v31 = vpop.f32.mrf.mxu3  ;;  %v829_v1 = vld [vmem:[%s1318_s28 + $0xc8] sm:$0xff] (%p1222_p6) }
  0xfc   : > { %749 = vst [vmem:[%s1318_s28 + $0xd8] sm:$0xff] %v615_v31  ;;  %v549_v32 = vpop.f32.mrf.mxu0  ;;  %v799_v50 = vld [vmem:[%s1318_s28 + $0x50] sm:$0xff] (%p1222_p6) }
  0xfd   : > { %734 = vst [vmem:[%s1318_s28 + $0x60] sm:$0xff] %v549_v32  ;;  %v598_v33 = vpop.f32.mrf.mxu1  ;;  %v801_v51 = vld [vmem:[%s1318_s28 + $0x58] sm:$0xff] (%p1222_p6) }
  0xfe   : > { %735 = vst [vmem:[%s1318_s28 + $0x68] sm:$0xff] %v598_v33 }
  0xff   : > { %800 = vst [vmem:[%s1360_s30 + $0x280] sm:$0xff] (%p1222_p6), %v799_v50 }
 0x100   : > { %802 = vst [vmem:[%s1360_s30 + $0x288] sm:$0xff] (%p1222_p6), %v801_v51 }
 0x101   : > { %828 = vst [vmem:[%s1360_s30 + $0x600] sm:$0xff] (%p1222_p6), %v827_v0 }
 0x102   : > { %v569_v34 = vpop.f32.mrf.mxu2  ;;  %v831_v2 = vld [vmem:[%s1318_s28 + $0xd0] sm:$0xff] (%p1222_p6)  ;;  %830 = vst [vmem:[%s1360_s30 + $0x608] sm:$0xff] (%p1222_p6), %v829_v1 }
 0x103   : > { %750 = vst [vmem:[%s1318_s28 + $0xe0] sm:$0xff] %v569_v34  ;;  %v618_v35 = vpop.f32.mrf.mxu3  ;;  %v833_v3 = vld [vmem:[%s1318_s28 + $0xd8] sm:$0xff] (%p1222_p6) }
 0x104   : > { %751 = vst [vmem:[%s1318_s28 + $0xe8] sm:$0xff] %v618_v35  ;;  %v551_v36 = vpop.f32.mrf.mxu0  ;;  %v803_v52 = vld [vmem:[%s1318_s28 + $0x60] sm:$0xff] (%p1222_p6) }
 0x105   : > { %736 = vst [vmem:[%s1318_s28 + $0x70] sm:$0xff] %v551_v36  ;;  %v600_v37 = vpop.f32.mrf.mxu1  ;;  %v805_v53 = vld [vmem:[%s1318_s28 + $0x68] sm:$0xff] (%p1222_p6) }
 0x106   : > { %737 = vst [vmem:[%s1318_s28 + $0x78] sm:$0xff] %v600_v37 }
 0x107   : > { %804 = vst [vmem:[%s1360_s30 + $0x300] sm:$0xff] (%p1222_p6), %v803_v52 }
 0x108   : > { %760 = sbr.rel (!%p1222_p6) target bundleno = 277 (0x115), region = 78  ;;  %806 = vst [vmem:[%s1360_s30 + $0x308] sm:$0xff] (%p1222_p6), %v805_v53 }
 0x109   : > { %832 = vst [vmem:[%s1360_s30 + $0x680] sm:$0xff] (%p1222_p6), %v831_v2 }
 0x10a   : > { %v571_v38 = vpop.f32.mrf.mxu2  ;;  %v835_v4 = vld [vmem:[%s1318_s28 + $0xe0] sm:$0xff] (%p1222_p6)  ;;  %834 = vst [vmem:[%s1360_s30 + $0x688] sm:$0xff] (%p1222_p6), %v833_v3 }
 0x10b   : > { %752 = vst [vmem:[%s1318_s28 + $0xf0] sm:$0xff] %v571_v38  ;;  %v620_v39 = vpop.f32.mrf.mxu3  ;;  %v837_v5 = vld [vmem:[%s1318_s28 + $0xe8] sm:$0xff] (%p1222_p6) }
 0x10c   : > { %753 = vst [vmem:[%s1318_s28 + $0xf8] sm:$0xff] %v620_v39  ;;  %v807_v54 = vld [vmem:[%s1318_s28 + $0x70] sm:$0xff] (%p1222_p6) }
 0x10d   : > { %v809_v55 = vld [vmem:[%s1318_s28 + $0x78] sm:$0xff]  ;;  %808 = vst [vmem:[%s1360_s30 + $0x380] sm:$0xff] %v807_v54 }
 0x10e   : > { %810 = vst [vmem:[%s1360_s30 + $0x388] sm:$0xff] %v809_v55 }
 0x10f   : > { %836 = vst [vmem:[%s1360_s30 + $0x700] sm:$0xff] %v835_v4 }
 0x110   : > { %838 = vst [vmem:[%s1360_s30 + $0x708] sm:$0xff] %v837_v5 }
 0x112   : > { %v839_v6 = vld [vmem:[%s1318_s28 + $0xf0] sm:$0xff] }
 0x113   : > { %v841_v7 = vld [vmem:[%s1318_s28 + $0xf8] sm:$0xff]  ;;  %840 = vst [vmem:[%s1360_s30 + $0x780] sm:$0xff] %v839_v6 }
 0x114   : > { %842 = vst [vmem:[%s1360_s30 + $0x788] sm:$0xff] %v841_v7 }
 0x115 PF: > { %s12_s13 = sadd.s32 1, %s1170_s13   ;;  %s1443_s9 = smov %s1158_s10 }
 0x116   : > { %p9_p11 = scmp.ge.s32.totalorder %s12_s13, 10   ;;  %s1444_s10 = smov %s1227_s19 }
 0x117   : > { %s1445_s11 = smov %s1166_s12  ;;  %s1446_s12 = smov %s1448_s14 }
 0x118   :  { %11 = sbr.rel (!%p9_p11) target bundleno = 3 (0x3), region = 135 }

// kernel: _lambda_.15
= control target key start
LH: loop header
LB: loop body
LE: loop exit
PB: predicated region body
PF: predicated region fallthrough
CT: control target
= control target key end

     0   :  { %s442_s9 = smov 0   ;;  %s564_s0 = inlined_call_operand.vmem [shape: f32[512,128], index: 0, kind: input, shape index: {}]   ;;  %s565_s1 = inlined_call_operand.vmem [shape: f32[1,128], index: 1, kind: input, shape index: {}]   ;;  %s566_s2 = inlined_call_operand.vmem [shape: f32[512,128], index: 2, kind: output, shape index: {}]  }
   0x1 LB: > { %s335_s10 = sadd.s32 4294967295, %s425_s9   ;;  %p339_p0 = scmp.ge.s32.totalorder %s425_s9, 1  ;;  %s425_s9 = sphi %s442_s9, %s12_s9  }
   0x2   : > { %p113_p1 = scmp.lt.s32.totalorder %s425_s9, 3 }
   0x4   : > { %p114_p2 = pnand %p339_p0, %p113_p1 }
   0x5   : > { %s340_s11 = sshll.u32 (!%p114_p2), %s335_s10, 5 }
   0x6   : > { %117 = sbr.rel (%p114_p2) target bundleno = 56 (0x38), region = 28  ;;  %p136_p3 = scmp.lt.s32.totalorder (!%p114_p2), %s340_s11, 63 }
   0xb   : > { %s568_s11 = smov (!%p136_p3, %s340_s11), 63  ;;  %v453_v0 = vld [vmem:[%s565_s1] ss:$0 sm:$0xff] }
   0xc   : > { %s341_s14 = sshll.u32 %s568_s11, 3 }
   0xd   : > { %s458_s17 = scalar_lea.vmem %s564_s0, %s341_s14  ;;  %s482_s20 = scalar_lea.vmem %s566_s2, %s341_s14 }
   0xe   : > { %v147_v1 = vld [vmem:[%s458_s17] sm:$0xff]  ;;  %v148_v2 = vld [vmem:[%s458_s17 + $0x8] sm:$0xff]  ;;  %v149_v3 = vld [vmem:[%s458_s17 + $0x10] sm:$0xff] }
   0xf   : > { %v183_v4 = vadd.f32 %v453_v0, %v147_v1  ;;  %v184_v5 = vadd.f32 %v453_v0, %v148_v2  ;;  %v185_v6 = vadd.f32 %v453_v0, %v149_v3  ;;  %v150_v7 = vld [vmem:[%s458_s17 + $0x18] sm:$0xff]  ;;  %v151_v8 = vld [vmem:[%s458_s17 + $0x20] sm:$0xff]  ;;  %v152_v9 = vld [vmem:[%s458_s17 + $0x28] sm:$0xff] }
  0x10   : > { %v186_v10 = vadd.f32 %v453_v0, %v150_v7  ;;  %v153_v11 = vld [vmem:[%s458_s17 + $0x30] sm:$0xff]  ;;  %v187_v12 = vadd.f32 %v453_v0, %v151_v8  ;;  %v154_v13 = vld [vmem:[%s458_s17 + $0x38] sm:$0xff]  ;;  %v188_v14 = vadd.f32 %v453_v0, %v152_v9  ;;  %v155_v15 = vld [vmem:[%s458_s17 + $0x40] sm:$0xff] }
  0x11   : > { %355 = vtanh.f32 %v183_v4  ;;  %v189_v16 = vadd.f32 %v453_v0, %v153_v11  ;;  %v156_v17 = vld [vmem:[%s458_s17 + $0x48] sm:$0xff]  ;;  %v190_v18 = vadd.f32 %v453_v0, %v154_v13  ;;  %v157_v19 = vld [vmem:[%s458_s17 + $0x50] sm:$0xff]  ;;  %v191_v20 = vadd.f32 %v453_v0, %v155_v15  ;;  %v158_v21 = vld [vmem:[%s458_s17 + $0x58] sm:$0xff] }
  0x12   : > { %357 = vtanh.f32 %v184_v5  ;;  %v192_v22 = vadd.f32 %v453_v0, %v156_v17  ;;  %v159_v23 = vld [vmem:[%s458_s17 + $0x60] sm:$0xff]  ;;  %v193_v25 = vadd.f32 %v453_v0, %v157_v19  ;;  %v160_v26 = vld [vmem:[%s458_s17 + $0x68] sm:$0xff]  ;;  %v194_v28 = vadd.f32 %v453_v0, %v158_v21  ;;  %v161_v29 = vld [vmem:[%s458_s17 + $0x70] sm:$0xff] }
  0x13   : > { %359 = vtanh.f32 %v185_v6  ;;  %v195_v31 = vadd.f32 %v453_v0, %v159_v23  ;;  %v162_v32 = vld [vmem:[%s458_s17 + $0x78] sm:$0xff]  ;;  %v196_v34 = vadd.f32 %v453_v0, %v160_v26  ;;  %v163_v35 = vld [vmem:[%s458_s17 + $0x80] sm:$0xff]  ;;  %v197_v37 = vadd.f32 %v453_v0, %v161_v29  ;;  %v164_v38 = vld [vmem:[%s458_s17 + $0x88] sm:$0xff] }
  0x14   : > { %361 = vtanh.f32 %v186_v10  ;;  %v198_v40 = vadd.f32 %v453_v0, %v162_v32  ;;  %v165_v41 = vld [vmem:[%s458_s17 + $0x90] sm:$0xff]  ;;  %v199_v43 = vadd.f32 %v453_v0, %v163_v35  ;;  %v166_v44 = vld [vmem:[%s458_s17 + $0x98] sm:$0xff]  ;;  %v200_v46 = vadd.f32 %v453_v0, %v164_v38  ;;  %v167_v47 = vld [vmem:[%s458_s17 + $0xa0] sm:$0xff] }
  0x15   : > { %363 = vtanh.f32 %v187_v12  ;;  %v201_v49 = vadd.f32 %v453_v0, %v165_v41  ;;  %v168_v50 = vld [vmem:[%s458_s17 + $0xa8] sm:$0xff]  ;;  %v202_v52 = vadd.f32 %v453_v0, %v166_v44  ;;  %v169_v53 = vld [vmem:[%s458_s17 + $0xb0] sm:$0xff]  ;;  %v203_v55 = vadd.f32 %v453_v0, %v167_v47  ;;  %v170_v56 = vld [vmem:[%s458_s17 + $0xb8] sm:$0xff] }
  0x16   : > { %365 = vtanh.f32 %v188_v14  ;;  %v204_v58 = vadd.f32 %v453_v0, %v168_v50  ;;  %v171_v59 = vld [vmem:[%s458_s17 + $0xc0] sm:$0xff]  ;;  %v205_v61 = vadd.f32 %v453_v0, %v169_v53  ;;  %v172_v62 = vld [vmem:[%s458_s17 + $0xc8] sm:$0xff]  ;;  %v206_v1 = vadd.f32 %v453_v0, %v170_v56  ;;  %v173_v2 = vld [vmem:[%s458_s17 + $0xd0] sm:$0xff] }
  0x17   : > { %v356_v24 = vpop.eup %355  ;;  %367 = vtanh.f32 %v189_v16  ;;  %v207_v4 = vadd.f32 %v453_v0, %v171_v59  ;;  %v174_v5 = vld [vmem:[%s458_s17 + $0xd8] sm:$0xff]  ;;  %v208_v7 = vadd.f32 %v453_v0, %v172_v62  ;;  %v175_v8 = vld [vmem:[%s458_s17 + $0xe0] sm:$0xff]  ;;  %v209_v10 = vadd.f32 %v453_v0, %v173_v2  ;;  %v176_v11 = vld [vmem:[%s458_s17 + $0xe8] sm:$0xff] }
  0x18   : > { %v358_v27 = vpop.eup %357  ;;  %247 = vst [vmem:[%s482_s20] sm:$0xff] %v356_v24  ;;  %369 = vtanh.f32 %v190_v18  ;;  %v210_v13 = vadd.f32 %v453_v0, %v174_v5  ;;  %v177_v14 = vld [vmem:[%s458_s17 + $0xf0] sm:$0xff]  ;;  %v211_v16 = vadd.f32 %v453_v0, %v175_v8  ;;  %v178_v17 = vld [vmem:[%s458_s17 + $0xf8] sm:$0xff]  ;;  %v212_v19 = vadd.f32 %v453_v0, %v176_v11 }
  0x19   : > { %v360_v30 = vpop.eup %359  ;;  %248 = vst [vmem:[%s482_s20 + $0x8] sm:$0xff] %v358_v27  ;;  %371 = vtanh.f32 %v191_v20  ;;  %v213_v21 = vadd.f32 %v453_v0, %v177_v14  ;;  %v214_v23 = vadd.f32 %v453_v0, %v178_v17 }
  0x1a   : > { %v362_v33 = vpop.eup %361  ;;  %249 = vst [vmem:[%s482_s20 + $0x10] sm:$0xff] %v360_v30  ;;  %373 = vtanh.f32 %v192_v22 }
  0x1b   : > { %v364_v36 = vpop.eup %363  ;;  %250 = vst [vmem:[%s482_s20 + $0x18] sm:$0xff] %v362_v33  ;;  %375 = vtanh.f32 %v193_v25 }
  0x1c   : > { %v366_v39 = vpop.eup %365  ;;  %251 = vst [vmem:[%s482_s20 + $0x20] sm:$0xff] %v364_v36  ;;  %377 = vtanh.f32 %v194_v28 }
  0x1d   : > { %v368_v42 = vpop.eup %367  ;;  %252 = vst [vmem:[%s482_s20 + $0x28] sm:$0xff] %v366_v39  ;;  %379 = vtanh.f32 %v195_v31 }
  0x1e   : > { %v370_v45 = vpop.eup %369  ;;  %253 = vst [vmem:[%s482_s20 + $0x30] sm:$0xff] %v368_v42  ;;  %381 = vtanh.f32 %v196_v34 }
  0x1f   : > { %v372_v48 = vpop.eup %371  ;;  %254 = vst [vmem:[%s482_s20 + $0x38] sm:$0xff] %v370_v45  ;;  %383 = vtanh.f32 %v197_v37 }
  0x20   : > { %v374_v51 = vpop.eup %373  ;;  %255 = vst [vmem:[%s482_s20 + $0x40] sm:$0xff] %v372_v48  ;;  %385 = vtanh.f32 %v198_v40 }
  0x21   : > { %v376_v54 = vpop.eup %375  ;;  %256 = vst [vmem:[%s482_s20 + $0x48] sm:$0xff] %v374_v51  ;;  %387 = vtanh.f32 %v199_v43 }
  0x22   : > { %v378_v57 = vpop.eup %377  ;;  %257 = vst [vmem:[%s482_s20 + $0x50] sm:$0xff] %v376_v54  ;;  %389 = vtanh.f32 %v200_v46 }
  0x23   : > { %v380_v60 = vpop.eup %379  ;;  %258 = vst [vmem:[%s482_s20 + $0x58] sm:$0xff] %v378_v57  ;;  %391 = vtanh.f32 %v201_v49 }
  0x24   : > { %v382_v63 = vpop.eup %381  ;;  %259 = vst [vmem:[%s482_s20 + $0x60] sm:$0xff] %v380_v60  ;;  %393 = vtanh.f32 %v202_v52 }
  0x25   : > { %v384_v3 = vpop.eup %383  ;;  %260 = vst [vmem:[%s482_s20 + $0x68] sm:$0xff] %v382_v63  ;;  %395 = vtanh.f32 %v203_v55 }
  0x26   : > { %v386_v6 = vpop.eup %385  ;;  %261 = vst [vmem:[%s482_s20 + $0x70] sm:$0xff] %v384_v3  ;;  %397 = vtanh.f32 %v204_v58 }
  0x27   : > { %v388_v9 = vpop.eup %387  ;;  %262 = vst [vmem:[%s482_s20 + $0x78] sm:$0xff] %v386_v6  ;;  %399 = vtanh.f32 %v205_v61 }
  0x28   : > { %v390_v12 = vpop.eup %389  ;;  %263 = vst [vmem:[%s482_s20 + $0x80] sm:$0xff] %v388_v9  ;;  %401 = vtanh.f32 %v206_v1 }
  0x29   : > { %v392_v15 = vpop.eup %391  ;;  %264 = vst [vmem:[%s482_s20 + $0x88] sm:$0xff] %v390_v12  ;;  %403 = vtanh.f32 %v207_v4 }
  0x2a   : > { %v394_v18 = vpop.eup %393  ;;  %265 = vst [vmem:[%s482_s20 + $0x90] sm:$0xff] %v392_v15  ;;  %405 = vtanh.f32 %v208_v7 }
  0x2b   : > { %v396_v20 = vpop.eup %395  ;;  %266 = vst [vmem:[%s482_s20 + $0x98] sm:$0xff] %v394_v18  ;;  %407 = vtanh.f32 %v209_v10 }
  0x2c   : > { %v398_v22 = vpop.eup %397  ;;  %267 = vst [vmem:[%s482_s20 + $0xa0] sm:$0xff] %v396_v20  ;;  %409 = vtanh.f32 %v210_v13 }
  0x2d   : > { %v400_v24 = vpop.eup %399  ;;  %268 = vst [vmem:[%s482_s20 + $0xa8] sm:$0xff] %v398_v22  ;;  %411 = vtanh.f32 %v211_v16 }
  0x2e   : > { %v402_v25 = vpop.eup %401  ;;  %269 = vst [vmem:[%s482_s20 + $0xb0] sm:$0xff] %v400_v24  ;;  %413 = vtanh.f32 %v212_v19 }
  0x2f   : > { %v404_v26 = vpop.eup %403  ;;  %270 = vst [vmem:[%s482_s20 + $0xb8] sm:$0xff] %v402_v25  ;;  %415 = vtanh.f32 %v213_v21 }
  0x30   : > { %v406_v27 = vpop.eup %405  ;;  %271 = vst [vmem:[%s482_s20 + $0xc0] sm:$0xff] %v404_v26  ;;  %417 = vtanh.f32 %v214_v23 }
  0x31   : > { %v408_v28 = vpop.eup %407  ;;  %272 = vst [vmem:[%s482_s20 + $0xc8] sm:$0xff] %v406_v27 }
  0x32   : > { %v410_v0 = vpop.eup %409  ;;  %273 = vst [vmem:[%s482_s20 + $0xd0] sm:$0xff] %v408_v28 }
  0x33   : > { %v412_v29 = vpop.eup %411  ;;  %274 = vst [vmem:[%s482_s20 + $0xd8] sm:$0xff] %v410_v0 }
  0x34   : > { %v414_v30 = vpop.eup %413  ;;  %275 = vst [vmem:[%s482_s20 + $0xe0] sm:$0xff] %v412_v29 }
  0x35   : > { %v416_v31 = vpop.eup %415  ;;  %276 = vst [vmem:[%s482_s20 + $0xe8] sm:$0xff] %v414_v30 }
  0x36   : > { %v418_v32 = vpop.eup %417  ;;  %277 = vst [vmem:[%s482_s20 + $0xf0] sm:$0xff] %v416_v31 }
  0x37   : > { %278 = vst [vmem:[%s482_s20 + $0xf8] sm:$0xff] %v418_v32 }
  0x38 PF: > { %s12_s9 = sadd.s32 1, %s425_s9  }
  0x39   : > { %p9_p4 = scmp.ge.s32.totalorder %s12_s9, 4  }
  0x3b   :  { %11 = sbr.rel (!%p9_p4) target bundleno = 1 (0x1), region = 58 }

</bundles_post_ra>
